<compile_context>
chip_gen: v5e
topology: v5e:2x2
jax: 0.10.0
libtpu: 0.0.40
codegen_flags: <defaults>
</compile_context>

<pallas_src>
import jax
import jax.numpy as jnp
from jax import lax
from jax.experimental import pallas as pl
from jax.experimental.pallas import tpu as pltpu

LN_EPS = 1e-5  # nn.LayerNorm default


def vit_block_kernel(x_ref, w_ref, b_ref, gamma_ref, beta_ref, o_ref):
    # x_ref:     (C_in, T)  channel-major spatial tile (batch dim squeezed)
    # w_ref:     (C_in, D)  1x1 conv weight, transposed, in the input dtype
    # b_ref:     (1, D)     conv bias (f32)
    # gamma_ref: (1, D)     LayerNorm weight (f32)
    # beta_ref:  (1, D)     LayerNorm bias (f32)
    # o_ref:     (T, D)
    x = x_ref[...]
    w = w_ref[...]

    # 1x1 conv == x_tile^T @ W: contract the channel (sublane) axis of both
    # operands on the MXU, accumulating in f32.  No explicit transpose and no
    # upcast of the operands.
    y = lax.dot_general(
        x, w,
        dimension_numbers=(((0,), (0,)), ((), ())),
        preferred_element_type=jnp.float32,
    )
    y = y + b_ref[...].astype(jnp.float32)

    # LayerNorm over the embed axis in f32 (biased variance, PyTorch semantics).
    mean = jnp.mean(y, axis=-1, keepdims=True)
    centered = y - mean
    var = jnp.mean(centered * centered, axis=-1, keepdims=True)
    y_hat = centered * lax.rsqrt(var + LN_EPS)          # rsqrt -> EUP slot

    out = y_hat * gamma_ref[...].astype(jnp.float32) + beta_ref[...].astype(jnp.float32)
    o_ref[...] = out.astype(o_ref.dtype)


def _choose_tile_hw(hw, c_in, d, itemsize, vmem_cap_bytes, max_tile=4096):
    """Largest legal spatial tile that fits the VMEM budget.

    Budget: double-buffered input (C_in x T) and output (T x D) tiles, the
    resident (constant-index) weight/bias blocks, plus ~4 f32 rows of D per
    token for in-kernel f32 temporaries, all under vmem_cap_bytes with headroom.
    Prefers a 128-aligned tile that divides HW (unmasked boundary block).
    """
    resident = 2 * (c_in * d + 3 * d) * 4          # weight + bias/gamma/beta
    headroom = 4 * 1024 * 1024
    per_token = 2 * (c_in + d) * itemsize + 4 * d * 4
    budget = max(vmem_cap_bytes - resident - headroom, per_token * 128)
    cap = min(int(budget // per_token), max_tile)
    cap = max(cap, 128)
    if hw <= cap:
        return hw                                   # full row: always layout-legal
    best = max((cap // 128) * 128, 128)
    # Prefer an exact divisor of HW among 128-aligned candidates (no masked
    # boundary block); otherwise take the largest 128-aligned tile under cap.
    t = best
    while t >= 128:
        if hw % t == 0:
            return t
        t -= 128
    return best


def vit_block(x_nchw, conv_w, conv_b, ln_gamma, ln_beta, *,
              tile_hw=None, vmem_cap_bytes=48 * 1024 * 1024):
    """x_nchw: (B, C_in, H, W).
    conv_w:  (embed_dim, C_in)  -- 1x1 conv weight with the trailing 1x1 squeezed.
    conv_b, ln_gamma, ln_beta: (embed_dim,)
    Returns (B, H*W, embed_dim), matching conv -> flatten(2) -> transpose(1,2) -> LayerNorm.
    """
    B, C_in, H, W = x_nchw.shape
    D = conv_w.shape[0]
    assert conv_w.shape == (D, C_in)
    HW = H * W

    # (B, C, H, W) -> (B, C, H*W): pure metadata reshape of the NCHW buffer;
    # no HBM transpose round trip before the kernel.
    x = x_nchw.reshape(B, C_in, HW)
    itemsize = x.dtype.itemsize

    w_t = conv_w.T.astype(x.dtype)                    # (C_in, D), native MXU dtype
    b2 = conv_b.reshape(1, D).astype(jnp.float32)
    g2 = ln_gamma.reshape(1, D).astype(jnp.float32)
    be2 = ln_beta.reshape(1, D).astype(jnp.float32)

    if tile_hw is None:
        tile_hw = _choose_tile_hw(HW, C_in, D, itemsize, vmem_cap_bytes)
    tile_hw = min(tile_hw, HW)

    grid = (B, pl.cdiv(HW, tile_hw))

    cost = pl.CostEstimate(
        flops=2 * B * HW * C_in * D,
        transcendentals=B * HW,  # one rsqrt per token
        bytes_accessed=(B * HW * C_in * itemsize      # read x
                        + C_in * D * itemsize         # read weight
                        + B * HW * D * itemsize),     # write out
    )

    out = pl.pallas_call(
        vit_block_kernel,
        out_shape=jax.ShapeDtypeStruct((B, HW, D), x.dtype),
        grid_spec=pltpu.PrefetchScalarGridSpec(
            num_scalar_prefetch=0,
            grid=grid,
            in_specs=[
                # channel-major activation tile: (1, C_in, tile_hw), batch squeezed
                pl.BlockSpec((None, C_in, tile_hw), lambda b, t: (b, 0, t)),
                # resident parameter blocks (constant block index -> fetched once)
                pl.BlockSpec((C_in, D), lambda b, t: (0, 0)),
                pl.BlockSpec((1, D), lambda b, t: (0, 0)),
                pl.BlockSpec((1, D), lambda b, t: (0, 0)),
                pl.BlockSpec((1, D), lambda b, t: (0, 0)),
            ],
            out_specs=pl.BlockSpec((None, tile_hw, D), lambda b, t: (b, t, 0)),
        ),
        compiler_params=pltpu.CompilerParams(
            dimension_semantics=("parallel", "parallel"),
            vmem_limit_bytes=int(vmem_cap_bytes),
        ),
        cost_estimate=cost,
    )(x, w_t, b2, g2, be2)

    return out


def vit_block_ref(x_nchw, conv_w, conv_b, ln_gamma, ln_beta):
    """Pure-JAX reference matching the PyTorch forward."""
    B, C_in, H, W = x_nchw.shape
    D = conv_w.shape[0]
    y = jnp.einsum("bchw,dc->bdhw", x_nchw, conv_w) + conv_b[None, :, None, None]
    y = y.reshape(B, D, H * W).transpose(0, 2, 1)
    mean = jnp.mean(y, axis=-1, keepdims=True)
    var = jnp.mean((y - mean) ** 2, axis=-1, keepdims=True)
    y_hat = (y - mean) / jnp.sqrt(var + LN_EPS)
    return y_hat * ln_gamma + ln_beta


if __name__ == "__main__":
    # Small shapes consistent with the module: batch=2, in_channels=4,
    # spatial=16x16, embed_dim=32.
    B, C_in, H, W, D = 2, 4, 16, 16, 32

    key = jax.random.PRNGKey(0)
    kx, kw, kb, kg, kbeta = jax.random.split(key, 5)

    x = jax.random.normal(kx, (B, C_in, H, W), dtype=jnp.float32)
    conv_w = jax.random.normal(kw, (D, C_in), dtype=jnp.float32) * 0.1
    conv_b = jax.random.normal(kb, (D,), dtype=jnp.float32) * 0.1
    ln_gamma = 1.0 + 0.05 * jax.random.normal(kg, (D,), dtype=jnp.float32)
    ln_beta = 0.05 * jax.random.normal(kbeta, (D,), dtype=jnp.float32)

    out = vit_block(x, conv_w, conv_b, ln_gamma, ln_beta)
    out = jax.block_until_ready(out)

    ref = vit_block_ref(x, conv_w, conv_b, ln_gamma, ln_beta)
    assert out.shape == (B, H * W, D), out.shape
    max_err = float(jnp.max(jnp.abs(out - ref)))
    assert jnp.allclose(out, ref, atol=1e-4, rtol=1e-4), max_err

    print("KERNEL_OK")
</pallas_src>

<mosaic_0001>
module attributes {stable_mosaic.version = 11 : i64} {
  func.func @vit_block_kernel(%arg0: i32, %arg1: i32, %arg2: memref<1x4x256xf32, #tpu.memory_space<vmem>>, %arg3: memref<4x32xf32, #tpu.memory_space<vmem>>, %arg4: memref<1x32xf32, #tpu.memory_space<vmem>>, %arg5: memref<1x32xf32, #tpu.memory_space<vmem>>, %arg6: memref<1x32xf32, #tpu.memory_space<vmem>>, %arg7: memref<1x256x32xf32, #tpu.memory_space<vmem>>) attributes {dimension_semantics = [#tpu.dimension_semantics<parallel>, #tpu.dimension_semantics<parallel>], iteration_bounds = array<i64: 2, 1>, scalar_prefetch = 0 : i64, scratch_operands = 0 : i64, tpu.core_type = #tpu.core_type<tc>, window_params = [{transform_indices = @transform_0, window_bounds = array<i64: 1, 4, 256>}, {pipeline_mode = #tpu.pipeline_mode<synchronous>, transform_indices = @transform_1, window_bounds = array<i64: 4, 32>}, {pipeline_mode = #tpu.pipeline_mode<synchronous>, transform_indices = @transform_2, window_bounds = array<i64: 1, 32>}, {pipeline_mode = #tpu.pipeline_mode<synchronous>, transform_indices = @transform_3, window_bounds = array<i64: 1, 32>}, {pipeline_mode = #tpu.pipeline_mode<synchronous>, transform_indices = @transform_4, window_bounds = array<i64: 1, 32>}, {transform_indices = @transform_5, window_bounds = array<i64: 1, 256, 32>}]} {
    %c0 = arith.constant 0 : index
    %c0_0 = arith.constant 0 : index
    %c0_1 = arith.constant 0 : index
    %0 = vector.load %arg2[%c0, %c0_0, %c0_1] : memref<1x4x256xf32, #tpu.memory_space<vmem>>, vector<1x4x256xf32>
    %1 = vector.shape_cast %0 : vector<1x4x256xf32> to vector<4x256xf32>
    %c0_2 = arith.constant 0 : index
    %c0_3 = arith.constant 0 : index
    %2 = vector.load %arg3[%c0_2, %c0_3] : memref<4x32xf32, #tpu.memory_space<vmem>>, vector<4x32xf32>
    %cst = arith.constant dense<0.000000e+00> : vector<256x32xf32>
    %3 = tpu.matmul %1, %2, %cst {dimension_numbers = #tpu.dot_dimension_numbers<[0], [0], [1], [1], [0, 1, 1, 1], [], []>} : vector<4x256xf32>, vector<4x32xf32>, vector<256x32xf32> -> vector<256x32xf32>
    %c0_4 = arith.constant 0 : index
    %c0_5 = arith.constant 0 : index
    %4 = vector.load %arg4[%c0_4, %c0_5] : memref<1x32xf32, #tpu.memory_space<vmem>>, vector<1x32xf32>
    %5 = vector.broadcast %4 : vector<1x32xf32> to vector<256x32xf32>
    %6 = arith.addf %3, %5 : vector<256x32xf32>
    %cst_6 = arith.constant dense<0.000000e+00> : vector<256xf32>
    %7 = vector.multi_reduction <add>, %6, %cst_6 [1] : vector<256x32xf32> to vector<256xf32>
    %8 = vector.shape_cast %7 : vector<256xf32> to vector<256x1xf32>
    %cst_7 = arith.constant 3.200000e+01 : f32
    %9 = vector.broadcast %cst_7 : f32 to vector<256x1xf32>
    %10 = arith.divf %8, %9 : vector<256x1xf32>
    %11 = vector.broadcast %10 : vector<256x1xf32> to vector<256x32xf32>
    %12 = arith.subf %6, %11 : vector<256x32xf32>
    %13 = arith.mulf %12, %12 : vector<256x32xf32>
    %cst_8 = arith.constant dense<0.000000e+00> : vector<256xf32>
    %14 = vector.multi_reduction <add>, %13, %cst_8 [1] : vector<256x32xf32> to vector<256xf32>
    %15 = vector.shape_cast %14 : vector<256xf32> to vector<256x1xf32>
    %cst_9 = arith.constant 3.200000e+01 : f32
    %16 = vector.broadcast %cst_9 : f32 to vector<256x1xf32>
    %17 = arith.divf %15, %16 : vector<256x1xf32>
    %cst_10 = arith.constant 9.99999974E-6 : f32
    %18 = vector.broadcast %cst_10 : f32 to vector<256x1xf32>
    %19 = arith.addf %17, %18 : vector<256x1xf32>
    %20 = math.rsqrt %19 : vector<256x1xf32>
    %21 = vector.broadcast %20 : vector<256x1xf32> to vector<256x32xf32>
    %22 = arith.mulf %12, %21 : vector<256x32xf32>
    %c0_11 = arith.constant 0 : index
    %c0_12 = arith.constant 0 : index
    %23 = vector.load %arg5[%c0_11, %c0_12] : memref<1x32xf32, #tpu.memory_space<vmem>>, vector<1x32xf32>
    %24 = vector.broadcast %23 : vector<1x32xf32> to vector<256x32xf32>
    %25 = arith.mulf %22, %24 : vector<256x32xf32>
    %c0_13 = arith.constant 0 : index
    %c0_14 = arith.constant 0 : index
    %26 = vector.load %arg6[%c0_13, %c0_14] : memref<1x32xf32, #tpu.memory_space<vmem>>, vector<1x32xf32>
    %27 = vector.broadcast %26 : vector<1x32xf32> to vector<256x32xf32>
    %28 = arith.addf %25, %27 : vector<256x32xf32>
    %c0_15 = arith.constant 0 : index
    %c0_16 = arith.constant 0 : index
    %c0_17 = arith.constant 0 : index
    %29 = vector.load %arg7[%c0_15, %c0_16, %c0_17] : memref<1x256x32xf32, #tpu.memory_space<vmem>>, vector<1x256x32xf32>
    %30 = vector.shape_cast %29 : vector<1x256x32xf32> to vector<256x32xf32>
    %31 = vector.shape_cast %28 : vector<256x32xf32> to vector<1x256x32xf32>
    tpu.vector_store %arg7[%c0_15, %c0_16, %c0_17], %31 {strides = array<i32>} : memref<1x256x32xf32, #tpu.memory_space<vmem>>, vector<1x256x32xf32>,
    return
  }
  func.func @transform_0(%arg0: i32, %arg1: i32) -> (i32, i32, i32) {
    %c0_i32 = arith.constant 0 : i32
    %c0_i32_0 = arith.constant 0 : i32
    return %arg0, %c0_i32, %arg1 : i32, i32, i32
  }
  func.func @transform_1(%arg0: i32, %arg1: i32) -> (i32, i32) {
    %c0_i32 = arith.constant 0 : i32
    %c0_i32_0 = arith.constant 0 : i32
    %c0_i32_1 = arith.constant 0 : i32
    return %c0_i32, %c0_i32_0 : i32, i32
  }
  func.func @transform_2(%arg0: i32, %arg1: i32) -> (i32, i32) {
    %c0_i32 = arith.constant 0 : i32
    %c0_i32_0 = arith.constant 0 : i32
    %c0_i32_1 = arith.constant 0 : i32
    return %c0_i32, %c0_i32_0 : i32, i32
  }
  func.func @transform_3(%arg0: i32, %arg1: i32) -> (i32, i32) {
    %c0_i32 = arith.constant 0 : i32
    %c0_i32_0 = arith.constant 0 : i32
    %c0_i32_1 = arith.constant 0 : i32
    return %c0_i32, %c0_i32_0 : i32, i32
  }
  func.func @transform_4(%arg0: i32, %arg1: i32) -> (i32, i32) {
    %c0_i32 = arith.constant 0 : i32
    %c0_i32_0 = arith.constant 0 : i32
    %c0_i32_1 = arith.constant 0 : i32
    return %c0_i32, %c0_i32_0 : i32, i32
  }
  func.func @transform_5(%arg0: i32, %arg1: i32) -> (i32, i32, i32) {
    %c0_i32 = arith.constant 0 : i32
    %c0_i32_0 = arith.constant 0 : i32
    return %arg0, %arg1, %c0_i32 : i32, i32, i32
  }
}

</mosaic_0001>

<bundles_post_ra>
// kernel: tpu_custom_call.1
= control target key start
LH: loop header
LB: loop body
LE: loop exit
PB: predicated region body
PF: predicated region fallthrough
CT: control target
= control target key end

     0   :  { %10 = vsyncpa [#allocation3], 0  ;;  %s2750_s0 = inlined_call_operand.hbm [shape: f32[2,4,256], index: 0, kind: input, shape index: {}]   ;;  %s2751_s1 = inlined_call_operand.hbm [shape: f32[4,32], index: 1, kind: input, shape index: {}]   ;;  %s2752_s2 = inlined_call_operand.vmem [shape: f32[1,32], index: 2, kind: input, shape index: {}]   ;;  %s2753_s3 = inlined_call_operand.vmem [shape: f32[1,32], index: 3, kind: input, shape index: {}]   ;;  %s2754_s4 = inlined_call_operand.vmem [shape: f32[1,32], index: 4, kind: input, shape index: {}]   ;;  %s2755_s5 = inlined_call_operand.vmem [shape: f32[2,256,32], index: 5, kind: output, shape index: {}]  }
   0x1   :  { %12 = vsyncpa [#allocation3 + $0x1], 0 }
   0x2   :  { %13 = vsyncpa [#allocation5], 0  ;;  %s1839_s18 = smov 0   ;;  %s1841_s19 = smov 0  }
   0x3   :  { %s1843_s20 = smov 0   ;;  %s1845_s21 = smov 0  }
   0x4   :  { %s1847_s22 = smov 0   ;;  %s1849_s23 = smov 0  }
   0x5 LB: > { %s1499_s24 = sadd.s32 4294967295, %s1805_s23   ;;  %p53_p0 = scmp.ne.s32.totalorder %s1789_s19, %s1785_s18  ;;  %s1805_s23 = sphi %s1849_s23, %s19_s23   ;;  %s1801_s22 = sphi %s1847_s22, %s2764_s22   ;;  %s1797_s21 = sphi %s1845_s21, %s2763_s21   ;;  %s1793_s20 = sphi %s1843_s20, %s2762_s20   ;;  %s1789_s19 = sphi %s1841_s19, %s2761_s19   ;;  %s1785_s18 = sphi %s1839_s18, %s2760_s18  }
   0x6   : > { %p1869_p1 = scmp.eq.s32.totalorder %s1499_s24, 0  ;;  %p1501_p2 = scmp.ge.s32.totalorder %s1805_s23, 1 }
   0x7   : > { %p176_p3 = scmp.lt.s32.totalorder %s1805_s23, 3  ;;  %s188_s29 = sshll.u32 %s2751_s1, 4  ;;  %s189_s29 = int_to_ptr.hbm [resolvable:$true] %s188_s29 }
   0x8   : > { %p1877_p4 = por %p1869_p1, %p53_p0  ;;  %s1807_s6 = smov [#allocation4]  }
   0x9   : > { %p1884_p5 = pnand %p1501_p2, %p176_p3  ;;  %s190_s7 = sshll.u32 %s1807_s6, 4  ;;  %s191_s7 = int_to_ptr.vmem [resolvable:$true] %s190_s7 }
   0xa   : > { %s31_s8 = sadd.s32 1, %s1801_s22  ;;  %p47_p9 = scmp.ne.s32.totalorder %s1793_s20, %s1789_s19 }
   0xb   : > { %p1558_p6 = pneg %p1884_p5  ;;  %p33_p8 = scmp.ge.s32.totalorder %s31_s8, 2 }
   0xc   : > { %p48_p10 = scmp.eq.s32.totalorder %s1805_s23, 0  ;;  %s40_s9 = sadd.s32 1, %s1793_s20 }
   0xd   : > { %p1559_p7 = pnand %p1558_p6, %p1869_p1  ;;  %s2766_s8 = smov (%p33_p8, %s31_s8), 0 }
   0xe   : > { %p1899_p11 = por %p48_p10, %p47_p9  ;;  %s35_s11 = ssub.s32 %s1801_s22, %s2766_s8 }
   0xf   : > { %1561 = dma.hbm_to_vmem [thread:$0]  (!%p1559_p7), %s189_s29, 64, %s191_s7, [#allocation5]  }
  0x10   : > { %s210_s12 = sand.u32 1, %s1793_s20   ;;  %p38_p12 = scmp.eq.s32.totalorder %s35_s11, 0 }
  0x11   : > { %p1567_p13 = scmp.lt.s32.totalorder %s1805_s23, 2  ;;  %s1504_s13 = sshll.u32 %s210_s12, 3 }
  0x12   : > { %s1547_s14 = sshll.u32 %s1801_s22, 3  ;;  %s214_s27 = scalar_lea.vmem [#allocation2], %s1504_s13 }
  0x13   : > { %s1909_s15 = scalar_select %p38_p12, %s1793_s20, %s40_s9  }
  0x14   : > { %s221_s18 = scalar_lea.hbm %s2750_s0, %s1547_s14  ;;  %s225_s28 = sshll.u32 %s214_s27, 4  ;;  %s226_s28 = int_to_ptr.vmem [resolvable:$true] %s225_s28 }
  0x15   : > { %s223_s24 = sshll.u32 %s221_s18, 4  ;;  %p1563_p0 = pnand %p1567_p13, %p1899_p11  ;;  %s224_s24 = int_to_ptr.hbm [resolvable:$true] %s223_s24 }
  0x16   : > { %s211_s29 = scalar_lea.sflag [#allocation3], %s210_s12  ;;  %234 = sbr.rel (%p1884_p5) target bundleno = 858 (0x35a), region = 40 }
  0x17   : > { %1565 = dma.hbm_to_vmem [thread:$0]  (!%p1563_p0), %s224_s24, 128, %s226_s28, %s211_s29  }
  0x18   : > { %s236_s6 = sand.u32 (!%p1884_p5), 1, %s1789_s19  }
  0x19   : > { %s1508_s7 = sshll.u32 (!%p1884_p5), %s236_s6, 3  ;;  %s237_s9 = scalar_lea.sflag (!%p1884_p5), [#allocation3], %s236_s6 }
  0x1a   : > { %s240_s11 = scalar_lea.vmem (!%p1884_p5), [#allocation2], %s1508_s7 }
  0x1b   : > { %1776 = dma.done.wait (%p1877_p4), %s237_s9, 128  }
  0x1c   : > { %1778 = vsyncadd (%p1877_p4), %s237_s9, 4294967168 }
  0x1d   : > { %1780 = dma.done.wait (%p1869_p1), [#allocation5], 64  }
  0x1e   : > { %1782 = vsyncadd (%p1869_p1), [#allocation5], 4294967232  ;;  %v288_v0 = vld [vmem:[%s240_s11] sm:$0xff]  ;;  %v289_v2 = vld [vmem:[#allocation4] sm:$0xf]  ;;  %vm461_vm0 = vcmask 1043456  }
  0x1f   : > { %295 = vst [vmem:[#allocation1] ss:$2 sm:$0xff] %v288_v0  ;;  %1550 = vmatpush.msk.msra.mxu2 %vm461_vm0, %v289_v2  ;;  %1551 = vmatpush.msk.msra.mxu3 %vm461_vm0, %v289_v2  ;;  %vm364_vm1 = vcmask 31744   ;;  %v1948_v23 = vld [vmem:[%s2752_s2] ss:$0 sm:$0xff]  ;;  %vm578_vm2 = vcmask 261120  }
  0x20   : > { %1512 = vmatpush.msk.msra.mxu0 %vm461_vm0, %v289_v2  ;;  %1549 = vmatpush.msk.msra.mxu1 %vm461_vm0, %v289_v2  ;;  %p279_p1 = scmp.lt.s32.totalorder %s1797_s21, 1 }
  0x22   : > { %s2768_s21 = smov (!%p279_p1, %s1797_s21), 1 }
  0x23   : > { %s1548_s12 = sshll.u32 %s2768_s21, 8 }
  0x24   : > { %s2387_s17 = scalar_lea.vmem %s2755_s5, %s1548_s12 }
  0x26   : > { %v297_v1 = vld.sshfl [vmem:[#allocation1 + $0x8] sm:$0xff pattern:$0x75316420]  ;;  %v296_v3 = vld.sshfl [vmem:[#allocation1] sm:$0xff pattern:$0x75316420] }
  0x27   : > { %332 = vxpose.xlu0.b32.start.end [1/1] (short) %v297_v1, 128 }
  0xa7   : > { %300 = vxpose.xlu0.b32.start.end [1/1] (short) %v296_v3, 128 }
  0xcb   : > { %v348_v4 = vpop.trf.xlu0 }
  0xcc   : > { %1529 = vmatmul.msk.f32.vlgmr.msra.gmra.mxu2 %vm364_vm1, %v348_v4 }
  0xd3   : > { %v349_v5 = vpop.trf.xlu0 }
  0xd4   : > { %1530 = vmatmul.msk.f32.gmra.mxu2 %vm364_vm1, %v349_v5 }
  0xdb   : > { %v350_v6 = vpop.trf.xlu0 }
  0xdc   : > { %1531 = vmatmul.msk.f32.gmra.mxu2 %vm364_vm1, %v350_v6 }
  0xe3   : > { %v351_v7 = vpop.trf.xlu0 }
  0xe4   : > { %1532 = vmatmul.msk.f32.gmra.mxu2 %vm364_vm1, %v351_v7 }
  0xeb   : > { %v352_v8 = vpop.trf.xlu0 }
  0xec   : > { %1533 = vmatmul.msk.f32.gmra.mxu2 %vm364_vm1, %v352_v8 }
  0xf3   : > { %v353_v9 = vpop.trf.xlu0 }
  0xf4   : > { %1534 = vmatmul.msk.f32.gmra.mxu2 %vm364_vm1, %v353_v9 }
  0xfb   : > { %v354_v10 = vpop.trf.xlu0 }
  0xfc   : > { %1535 = vmatmul.msk.f32.gmra.mxu2 %vm364_vm1, %v354_v10 }
 0x103   : > { %v355_v11 = vpop.trf.xlu0 }
 0x104   : > { %1536 = vmatmul.msk.f32.gmra.mxu2 %vm364_vm1, %v355_v11 }
 0x10b   : > { %v356_v12 = vpop.trf.xlu0 }
 0x10c   : > { %1537 = vmatmul.msk.f32.vlgmr.msra.gmra.mxu3 %vm364_vm1, %v356_v12 }
 0x113   : > { %v357_v13 = vpop.trf.xlu0 }
 0x114   : > { %1538 = vmatmul.msk.f32.gmra.mxu3 %vm364_vm1, %v357_v13 }
 0x11b   : > { %v358_v14 = vpop.trf.xlu0 }
 0x11c   : > { %1539 = vmatmul.msk.f32.gmra.mxu3 %vm364_vm1, %v358_v14 }
 0x123   : > { %v359_v15 = vpop.trf.xlu0 }
 0x124   : > { %1540 = vmatmul.msk.f32.gmra.mxu3 %vm364_vm1, %v359_v15 }
 0x12b   : > { %v360_v16 = vpop.trf.xlu0 }
 0x12c   : > { %1541 = vmatmul.msk.f32.gmra.mxu3 %vm364_vm1, %v360_v16 }
 0x133   : > { %v361_v17 = vpop.trf.xlu0 }
 0x134   : > { %1542 = vmatmul.msk.f32.gmra.mxu3 %vm364_vm1, %v361_v17 }
 0x13b   : > { %v362_v18 = vpop.trf.xlu0 }
 0x13c   : > { %1543 = vmatmul.msk.f32.gmra.mxu3 %vm364_vm1, %v362_v18 }
 0x143   : > { %v363_v19 = vpop.trf.xlu0 }
 0x144   : > { %1544 = vmatmul.msk.f32.gmra.mxu3 %vm364_vm1, %v363_v19 }
 0x14b   : > { %v316_v20 = vpop.trf.xlu0 }
 0x14c   : > { %1513 = vmatmul.msk.f32.vlgmr.msra.gmra.mxu0 %vm364_vm1, %v316_v20 }
 0x14f   : > { %v530_v21 = vpop.f32.mrf.mxu2 }
 0x150   : > { %v1975_v44 = vadd.f32 %v1948_v23, %v530_v21 }
 0x152   : > { %v627_v47 = vsel %vm578_vm2, %v1975_v44, 0.0 }
 0x153   : > { %v317_v22 = vpop.trf.xlu0 }
 0x154   : > { %1514 = vmatmul.msk.f32.gmra.mxu0 %vm364_vm1, %v317_v22 }
 0x157   : > { %v533_v24 = vpop.f32.mrf.mxu2 }
 0x158   : > { %v1951_v25 = vadd.f32 %v1948_v23, %v533_v24 }
 0x15a   : > { %v630_v26 = vsel %vm578_vm2, %v1951_v25, 0.0 }
 0x15b   : > { %631 = vadd.xlane.f32.xlu2 %v630_v26  ;;  %v318_v27 = vpop.trf.xlu0 }
 0x15c   : > { %1515 = vmatmul.msk.f32.gmra.mxu0 %vm364_vm1, %v318_v27 }
 0x15f   : > { %v536_v46 = vpop.f32.mrf.mxu2 }
 0x160   : > { %v1990_v54 = vadd.f32 %v1948_v23, %v536_v46 }
 0x162   : > { %v633_v57 = vsel %vm578_vm2, %v1990_v54, 0.0 }
 0x163   : > { %v319_v28 = vpop.trf.xlu0 }
 0x164   : > { %1516 = vmatmul.msk.f32.gmra.mxu0 %vm364_vm1, %v319_v28 }
 0x167   : > { %v539_v53 = vpop.f32.mrf.mxu2 }
 0x168   : > { %v2000_v60 = vadd.f32 %v1948_v23, %v539_v53 }
 0x16a   : > { %v636_v63 = vsel %vm578_vm2, %v2000_v60, 0.0 }
 0x16b   : > { %v320_v29 = vpop.trf.xlu0 }
 0x16c   : > { %1517 = vmatmul.msk.f32.gmra.mxu0 %vm364_vm1, %v320_v29 }
 0x16f   : > { %v542_v59 = vpop.f32.mrf.mxu2 }
 0x170   : > { %v2010_v1 = vadd.f32 %v1948_v23, %v542_v59 }
 0x172   : > { %v639_v5 = vsel %vm578_vm2, %v2010_v1, 0.0 }
 0x173   : > { %v321_v30 = vpop.trf.xlu0 }
 0x174   : > { %1518 = vmatmul.msk.f32.gmra.mxu0 %vm364_vm1, %v321_v30 }
 0x177   : > { %v545_v2 = vpop.f32.mrf.mxu2 }
 0x178   : > { %v2020_v7 = vadd.f32 %v1948_v23, %v545_v2 }
 0x17a   : > { %v642_v11 = vsel %vm578_vm2, %v2020_v7, 0.0 }
 0x17b   : > { %v322_v31 = vpop.trf.xlu0 }
 0x17c   : > { %1519 = vmatmul.msk.f32.gmra.mxu0 %vm364_vm1, %v322_v31 }
 0x17f   : > { %v548_v10 = vpop.f32.mrf.mxu2 }
 0x180   : > { %v2030_v14 = vadd.f32 %v1948_v23, %v548_v10 }
 0x182   : > { %v645_v17 = vsel %vm578_vm2, %v2030_v14, 0.0 }
 0x183   : > { %v323_v32 = vpop.trf.xlu0 }
 0x184   : > { %1520 = vmatmul.msk.f32.gmra.mxu0 %vm364_vm1, %v323_v32 }
 0x187   : > { %v551_v19 = vpop.f32.mrf.mxu2 }
 0x188   : > { %v2040_v20 = vadd.f32 %v1948_v23, %v551_v19 }
 0x18a   : > { %v648_v26 = vsel %vm578_vm2, %v2040_v20, 0.0 }
 0x18b   : > { %v324_v33 = vpop.trf.xlu0 }
 0x18c   : > { %1521 = vmatmul.msk.f32.vlgmr.msra.gmra.mxu1 %vm364_vm1, %v324_v33 }
 0x18f   : > { %v554_v13 = vpop.f32.mrf.mxu3 }
 0x190   : > { %v2050_v28 = vadd.f32 %v1948_v23, %v554_v13 }
 0x192   : > { %v651_v32 = vsel %vm578_vm2, %v2050_v28, 0.0 }
 0x193   : > { %v325_v34 = vpop.trf.xlu0 }
 0x194   : > { %1522 = vmatmul.msk.f32.gmra.mxu1 %vm364_vm1, %v325_v34 }
 0x197   : > { %v557_v21 = vpop.f32.mrf.mxu3 }
 0x198   : > { %v2060_v34 = vadd.f32 %v1948_v23, %v557_v21 }
 0x19b   : > { %v326_v35 = vpop.trf.xlu0 }
 0x19c   : > { %1523 = vmatmul.msk.f32.gmra.mxu1 %vm364_vm1, %v326_v35 }
 0x19f   : > { %v560_v31 = vpop.f32.mrf.mxu3 }
 0x1a3   : > { %v327_v36 = vpop.trf.xlu0 }
 0x1a4   : > { %1524 = vmatmul.msk.f32.gmra.mxu1 %vm364_vm1, %v327_v36 }
 0x1ab   : > { %v328_v37 = vpop.trf.xlu0 }
 0x1ac   : > { %1525 = vmatmul.msk.f32.gmra.mxu1 %vm364_vm1, %v328_v37  ;;  %v654_v37 = vsel %vm578_vm2, %v2060_v34, 0.0 }
 0x1b3   : > { %v329_v38 = vpop.trf.xlu0 }
 0x1b4   : > { %1526 = vmatmul.msk.f32.gmra.mxu1 %vm364_vm1, %v329_v38 }
 0x1bb   : > { %v330_v39 = vpop.trf.xlu0 }
 0x1bc   : > { %1527 = vmatmul.msk.f32.gmra.mxu1 %vm364_vm1, %v330_v39  ;;  %v563_v39 = vpop.f32.mrf.mxu3 }
 0x1c3   : > { %v331_v40 = vpop.trf.xlu0 }
 0x1c4   : > { %1528 = vmatmul.msk.f32.gmra.mxu1 %vm364_vm1, %v331_v40  ;;  %v2070_v40 = vadd.f32 %v1948_v23, %v560_v31 }
 0x1c9   : > { %v482_v41 = vpop.f32.mrf.mxu0 }
 0x1ca   : > { %v1970_v42 = vadd.f32 %v1948_v23, %v482_v41 }
 0x1cc   : > { %v579_v43 = vsel %vm578_vm2, %v1970_v42, 0.0 }
 0x1cd   : > { %580 = vadd.xlane.f32.xlu1 %v579_v43 }
 0x1d1   : > { %v485_v45 = vpop.f32.mrf.mxu0 }
 0x1d2   : > { %v1980_v48 = vadd.f32 %v1948_v23, %v485_v45  ;;  %v657_v45 = vsel %vm578_vm2, %v2070_v40, 0.0 }
 0x1d4   : > { %v582_v51 = vsel %vm578_vm2, %v1980_v48, 0.0 }
 0x1d5   : > { %628 = vadd.xlane.f32.xlu1 %v627_v47  ;;  %v566_v47 = vpop.f32.mrf.mxu3 }
 0x1d6   : > { %v2090_v59 = vadd.f32 %v1948_v23, %v566_v47 }
 0x1d9   : > { %v488_v49 = vpop.f32.mrf.mxu0 }
 0x1da   : > { %v1983_v50 = vadd.f32 %v1948_v23, %v488_v49  ;;  %v1808_v49 = vmov 32.0  }
 0x1db   : > { %1623 = vrcp.f32 %v1808_v49 }
 0x1dc   : > { %v585_v52 = vsel %vm578_vm2, %v1983_v50, 0.0 }
 0x1dd   : > { %583 = vadd.xlane.f32.xlu1 %v582_v51  ;;  %586 = vadd.xlane.f32.xlu2 %v585_v52  ;;  %v2080_v51 = vadd.f32 %v1948_v23, %v563_v39 }
 0x1e1   : > { %v491_v55 = vpop.f32.mrf.mxu0 }
 0x1e2   : > { %v1993_v56 = vadd.f32 %v1948_v23, %v491_v55  ;;  %v660_v55 = vsel %vm578_vm2, %v2080_v51, 0.0 }
 0x1e4   : > { %v588_v58 = vsel %vm578_vm2, %v1993_v56, 0.0 }
 0x1e5   : > { %634 = vadd.xlane.f32.xlu1 %v633_v57  ;;  %589 = vadd.xlane.f32.xlu2 %v588_v58  ;;  %v1624_v58 = vpop.eup %1623 }
 0x1e6   : > { %vm680_vm3 = vweird.f32 %v1624_v58 }
 0x1e9   : > { %v494_v61 = vpop.f32.mrf.mxu0 }
 0x1ea   : > { %v2003_v62 = vadd.f32 %v1948_v23, %v494_v61  ;;  %v676_v61 = vmul.f32 32.0, %v1624_v58 }
 0x1ec   : > { %v591_v0 = vsel %vm578_vm2, %v2003_v62, 0.0 }
 0x1ed   : > { %637 = vadd.xlane.f32.xlu2 %v636_v63  ;;  %592 = vadd.xlane.f32.xlu1 %v591_v0  ;;  %v569_v63 = vpop.f32.mrf.mxu3 }
 0x1f1   : > { %v497_v3 = vpop.f32.mrf.mxu0 }
 0x1f2   : > { %v2013_v4 = vadd.f32 %v1948_v23, %v497_v3  ;;  %v677_v3 = vsub.f32 1.0, %v676_v61 }
 0x1f4   : > { %v594_v6 = vsel %vm578_vm2, %v2013_v4, 0.0  ;;  %v678_v10 = vmul.f32 %v1624_v58, %v677_v3 }
 0x1f5   : > { %640 = vadd.xlane.f32.xlu1 %v639_v5  ;;  %595 = vadd.xlane.f32.xlu2 %v594_v6  ;;  %v663_v5 = vsel %vm578_vm2, %v2090_v59, 0.0  ;;  %v572_v13 = vpop.f32.mrf.mxu3 }
 0x1f6   : > { %v2110_v19 = vadd.f32 %v1948_v23, %v572_v13 }
 0x1f9   : > { %v500_v8 = vpop.f32.mrf.mxu0 }
 0x1fa   : > { %v2023_v9 = vadd.f32 %v1948_v23, %v500_v8  ;;  %v2100_v8 = vadd.f32 %v1948_v23, %v569_v63 }
 0x1fc   : > { %v597_v12 = vsel %vm578_vm2, %v2023_v9, 0.0 }
 0x1fd   : > { %643 = vadd.xlane.f32.xlu2 %v642_v11  ;;  %598 = vadd.xlane.f32.xlu1 %v597_v12 }
 0x201   : > { %v503_v15 = vpop.f32.mrf.mxu0 }
 0x202   : > { %v2033_v16 = vadd.f32 %v1948_v23, %v503_v15  ;;  %v679_v15 = vadd.f32 %v1624_v58, %v678_v10 }
 0x204   : > { %v600_v18 = vsel %vm578_vm2, %v2033_v16, 0.0  ;;  %v2112_v21 = vsel %vm680_vm3, %v1624_v58, %v679_v15 }
 0x205   : > { %646 = vadd.xlane.f32.xlu1 %v645_v17  ;;  %601 = vadd.xlane.f32.xlu2 %v600_v18  ;;  %v666_v17 = vsel %vm578_vm2, %v2100_v8, 0.0 }
 0x209   : > { %v506_v22 = vpop.f32.mrf.mxu1 }
 0x20a   : > { %v2043_v24 = vadd.f32 %v1948_v23, %v506_v22 }
 0x20c   : > { %v603_v27 = vsel %vm578_vm2, %v2043_v24, 0.0 }
 0x20d   : > { %649 = vadd.xlane.f32.xlu2 %v648_v26  ;;  %604 = vadd.xlane.f32.xlu1 %v603_v27 }
 0x211   : > { %v509_v29 = vpop.f32.mrf.mxu1 }
 0x212   : > { %v2053_v30 = vadd.f32 %v1948_v23, %v509_v29 }
 0x214   : > { %v606_v33 = vsel %vm578_vm2, %v2053_v30, 0.0 }
 0x215   : > { %652 = vadd.xlane.f32.xlu1 %v651_v32  ;;  %607 = vadd.xlane.f32.xlu2 %v606_v33  ;;  %v669_v32 = vsel %vm578_vm2, %v2110_v19, 0.0 }
 0x219   : > { %v512_v35 = vpop.f32.mrf.mxu1 }
 0x21a   : > { %v2063_v36 = vadd.f32 %v1948_v23, %v512_v35  ;;  %v575_v35 = vpop.f32.mrf.mxu3 }
 0x21c   : > { %v609_v38 = vsel %vm578_vm2, %v2063_v36, 0.0 }
 0x21d   : > { %655 = vadd.xlane.f32.xlu2 %v654_v37  ;;  %610 = vadd.xlane.f32.xlu1 %v609_v38  ;;  %v632_v37 = vpop.xlane.xlu2 %631  ;;  %v2126_v38 = vadd.f32 %v1948_v23, %v575_v35 }
 0x21e   : > { %v699_v39 = vmul.f32 %v2112_v21, %v632_v37 }
 0x21f   : > { %v672_v47 = vsel %vm578_vm2, %v2126_v38, 0.0 }
 0x221   : > { %v515_v41 = vpop.f32.mrf.mxu1 }
 0x222   : > { %v2073_v43 = vadd.f32 %v1948_v23, %v515_v41 }
 0x224   : > { %v612_v46 = vsel %vm578_vm2, %v2073_v43, 0.0 }
 0x225   : > { %658 = vadd.xlane.f32.xlu1 %v657_v45  ;;  %613 = vadd.xlane.f32.xlu2 %v612_v46  ;;  %v2132_v45 = vsub.f32 %v1951_v25, %v699_v39 }
 0x229   : > { %v518_v52 = vpop.f32.mrf.mxu1 }
 0x22a   : > { %v2083_v53 = vadd.f32 %v1948_v23, %v518_v52 }
 0x22c   : > { %v615_v57 = vsel %vm578_vm2, %v2083_v53, 0.0 }
 0x22d   : > { %661 = vadd.xlane.f32.xlu2 %v660_v55  ;;  %616 = vadd.xlane.f32.xlu1 %v615_v57 }
 0x231   : > { %v521_v0 = vpop.f32.mrf.mxu1 }
 0x232   : > { %v2093_v2 = vadd.f32 %v1948_v23, %v521_v0 }
 0x234   : > { %v618_v6 = vsel %vm578_vm2, %v2093_v2, 0.0 }
 0x235   : > { %664 = vadd.xlane.f32.xlu1 %v663_v5  ;;  %619 = vadd.xlane.f32.xlu2 %v618_v6 }
 0x239   : > { %v524_v11 = vpop.f32.mrf.mxu1 }
 0x23a   : > { %v2103_v12 = vadd.f32 %v1948_v23, %v524_v11 }
 0x23c   : > { %v621_v18 = vsel %vm578_vm2, %v2103_v12, 0.0 }
 0x23d   : > { %667 = vadd.xlane.f32.xlu2 %v666_v17  ;;  %622 = vadd.xlane.f32.xlu1 %v621_v18 }
 0x240   : > { %v581_v22 = vpop.xlane.xlu1 %580 }
 0x241   : > { %v682_v26 = vmul.f32 %v2112_v21, %v581_v22  ;;  %v527_v27 = vpop.f32.mrf.mxu1 }
 0x242   : > { %v2116_v29 = vadd.f32 %v1948_v23, %v527_v27  ;;  %v763_v23 = vmul.f32 %v2132_v45, %v2132_v45 }
 0x243   : > { %v2119_v31 = vsub.f32 %v1970_v42, %v682_v26 }
 0x244   : > { %v624_v33 = vsel %vm578_vm2, %v2116_v29, 0.0  ;;  %v829_v63 = vsel %vm578_vm2, %v763_v23, 0.0 }
 0x245   : > { %670 = vadd.xlane.f32.xlu1 %v669_v32  ;;  %625 = vadd.xlane.f32.xlu2 %v624_v33  ;;  %v746_v42 = vmul.f32 %v2119_v31, %v2119_v31 }
 0x247   : > { %v778_v46 = vsel %vm578_vm2, %v746_v42, 0.0 }
 0x248   : > { %v629_v41 = vpop.xlane.xlu1 %628 }
 0x249   : > { %v698_v58 = vmul.f32 %v2112_v21, %v629_v41 }
 0x24b   : > { %v2154_v5 = vsub.f32 %v1975_v44, %v698_v58 }
 0x24d   : > { %779 = vadd.xlane.f32.xlu1 %v778_v46  ;;  %673 = vadd.xlane.f32.xlu2 %v672_v47  ;;  %v762_v17 = vmul.f32 %v2154_v5, %v2154_v5 }
 0x24f   : > { %v826_v26 = vsel %vm578_vm2, %v762_v17, 0.0 }
 0x250   : > { %v584_v49 = vpop.xlane.xlu1 %583  ;;  %v587_v52 = vpop.xlane.xlu2 %586 }
 0x251   : > { %v683_v55 = vmul.f32 %v2112_v21, %v584_v49  ;;  %v684_v57 = vmul.f32 %v2112_v21, %v587_v52 }
 0x253   : > { %v2143_v25 = vsub.f32 %v1980_v48, %v683_v55  ;;  %v2146_v61 = vsub.f32 %v1983_v50, %v684_v57 }
 0x255   : > { %830 = vadd.xlane.f32.xlu1 %v829_v63  ;;  %v748_v0 = vmul.f32 %v2146_v61, %v2146_v61  ;;  %v747_v3 = vmul.f32 %v2143_v25, %v2143_v25 }
 0x257   : > { %v784_v6 = vsel %vm578_vm2, %v748_v0, 0.0  ;;  %v781_v48 = vsel %vm578_vm2, %v747_v3, 0.0 }
 0x258   : > { %v635_v10 = vpop.xlane.xlu1 %634  ;;  %785 = vadd.xlane.f32.xlu0 %v784_v6  ;;  %v590_v50 = vpop.xlane.xlu2 %589  ;;  %782 = vadd.xlane.f32.xlu2 %v781_v48 }
 0x259   : > { %v685_v11 = vmul.f32 %v2112_v21, %v590_v50  ;;  %v700_v13 = vmul.f32 %v2112_v21, %v635_v10 }
 0x25b   : > { %v2161_v15 = vsub.f32 %v1993_v56, %v685_v11  ;;  %v2168_v18 = vsub.f32 %v1990_v54, %v700_v13 }
 0x25d   : > { %v749_v44 = vmul.f32 %v2161_v15, %v2161_v15  ;;  %v764_v37 = vmul.f32 %v2168_v18, %v2168_v18 }
 0x25f   : > { %v787_v22 = vsel %vm578_vm2, %v749_v44, 0.0  ;;  %v832_v42 = vsel %vm578_vm2, %v764_v37, 0.0 }
 0x260   : > { %v638_v27 = vpop.xlane.xlu2 %637  ;;  %v593_v32 = vpop.xlane.xlu1 %592  ;;  %788 = vadd.xlane.f32.xlu1 %v787_v22  ;;  %827 = vadd.xlane.f32.xlu2 %v826_v26 }
 0x261   : > { %v701_v56 = vmul.f32 %v2112_v21, %v638_v27  ;;  %v686_v35 = vmul.f32 %v2112_v21, %v593_v32 }
 0x263   : > { %v2174_v33 = vsub.f32 %v2000_v60, %v701_v56  ;;  %v2182_v39 = vsub.f32 %v2003_v62, %v686_v35 }
 0x265   : > { %v765_v54 = vmul.f32 %v2174_v33, %v2174_v33  ;;  %v750_v23 = vmul.f32 %v2182_v39, %v2182_v39 }
 0x267   : > { %v835_v41 = vsel %vm578_vm2, %v765_v54, 0.0  ;;  %v790_v58 = vsel %vm578_vm2, %v750_v23, 0.0 }
 0x268   : > { %v641_v46 = vpop.xlane.xlu1 %640  ;;  %v596_v47 = vpop.xlane.xlu2 %595  ;;  %836 = vadd.xlane.f32.xlu1 %v835_v41  ;;  %833 = vadd.xlane.f32.xlu2 %v832_v42 }
 0x269   : > { %v687_v60 = vmul.f32 %v2112_v21, %v596_v47  ;;  %v702_v49 = vmul.f32 %v2112_v21, %v641_v46 }
 0x26b   : > { %v2189_v52 = vsub.f32 %v2013_v4, %v687_v60  ;;  %v2196_v55 = vsub.f32 %v2010_v1, %v702_v49 }
 0x26d   : > { %v751_v62 = vmul.f32 %v2189_v52, %v2189_v52  ;;  %v766_v48 = vmul.f32 %v2196_v55, %v2196_v55 }
 0x26f   : > { %v793_v57 = vsel %vm578_vm2, %v751_v62, 0.0  ;;  %v838_v11 = vsel %vm578_vm2, %v766_v48, 0.0 }
 0x270   : > { %v644_v63 = vpop.xlane.xlu2 %643  ;;  %v599_v0 = vpop.xlane.xlu1 %598  ;;  %794 = vadd.xlane.f32.xlu1 %v793_v57  ;;  %791 = vadd.xlane.f32.xlu2 %v790_v58 }
 0x271   : > { %v703_v4 = vmul.f32 %v2112_v21, %v644_v63  ;;  %v688_v6 = vmul.f32 %v2112_v21, %v599_v0 }
 0x273   : > { %v2202_v3 = vsub.f32 %v2020_v7, %v703_v4  ;;  %v2210_v10 = vsub.f32 %v2023_v9, %v688_v6 }
 0x275   : > { %v767_v1 = vmul.f32 %v2202_v3, %v2202_v3  ;;  %v752_v26 = vmul.f32 %v2210_v10, %v2210_v10 }
 0x277   : > { %v841_v50 = vsel %vm578_vm2, %v767_v1, 0.0  ;;  %v796_v56 = vsel %vm578_vm2, %v752_v26, 0.0 }
 0x278   : > { %v647_v13 = vpop.xlane.xlu1 %646  ;;  %v602_v17 = vpop.xlane.xlu2 %601  ;;  %842 = vadd.xlane.f32.xlu1 %v841_v50  ;;  %839 = vadd.xlane.f32.xlu2 %v838_v11 }
 0x279   : > { %v689_v7 = vmul.f32 %v2112_v21, %v602_v17  ;;  %v704_v44 = vmul.f32 %v2112_v21, %v647_v13 }
 0x27b   : > { %v2217_v22 = vsub.f32 %v2033_v16, %v689_v7  ;;  %v2224_v27 = vsub.f32 %v2030_v14, %v704_v44 }
 0x27d   : > { %v753_v9 = vmul.f32 %v2217_v22, %v2217_v22  ;;  %v768_v42 = vmul.f32 %v2224_v27, %v2224_v27 }
 0x27f   : > { %v799_v32 = vsel %vm578_vm2, %v753_v9, 0.0  ;;  %v844_v60 = vsel %vm578_vm2, %v768_v42, 0.0 }
 0x280   : > { %v650_v35 = vpop.xlane.xlu2 %649  ;;  %v605_v37 = vpop.xlane.xlu1 %604  ;;  %800 = vadd.xlane.f32.xlu1 %v799_v32  ;;  %797 = vadd.xlane.f32.xlu2 %v796_v56 }
 0x281   : > { %v705_v16 = vmul.f32 %v2112_v21, %v650_v35  ;;  %v690_v41 = vmul.f32 %v2112_v21, %v605_v37 }
 0x283   : > { %v2230_v54 = vsub.f32 %v2040_v20, %v705_v16  ;;  %v2238_v46 = vsub.f32 %v2043_v24, %v690_v41 }
 0x285   : > { %v769_v14 = vmul.f32 %v2230_v54, %v2230_v54  ;;  %v754_v58 = vmul.f32 %v2238_v46, %v2238_v46 }
 0x287   : > { %v847_v47 = vsel %vm578_vm2, %v769_v14, 0.0  ;;  %v802_v4 = vsel %vm578_vm2, %v754_v58, 0.0 }
 0x288   : > { %v653_v49 = vpop.xlane.xlu1 %652  ;;  %v608_v23 = vpop.xlane.xlu2 %607  ;;  %848 = vadd.xlane.f32.xlu1 %v847_v47  ;;  %845 = vadd.xlane.f32.xlu2 %v844_v60 }
 0x289   : > { %v691_v20 = vmul.f32 %v2112_v21, %v608_v23  ;;  %v706_v62 = vmul.f32 %v2112_v21, %v653_v49 }
 0x28b   : > { %v2245_v57 = vsub.f32 %v2053_v30, %v691_v20  ;;  %v2252_v63 = vsub.f32 %v2050_v28, %v706_v62 }
 0x28d   : > { %v755_v24 = vmul.f32 %v2245_v57, %v2245_v57  ;;  %v770_v11 = vmul.f32 %v2252_v63, %v2252_v63 }
 0x28f   : > { %v805_v0 = vsel %vm578_vm2, %v755_v24, 0.0  ;;  %v850_v7 = vsel %vm578_vm2, %v770_v11, 0.0 }
 0x290   : > { %v656_v6 = vpop.xlane.xlu2 %655  ;;  %v611_v48 = vpop.xlane.xlu1 %610  ;;  %806 = vadd.xlane.f32.xlu1 %v805_v0  ;;  %803 = vadd.xlane.f32.xlu2 %v802_v4 }
 0x291   : > { %v707_v30 = vmul.f32 %v2112_v21, %v656_v6  ;;  %v692_v50 = vmul.f32 %v2112_v21, %v611_v48 }
 0x293   : > { %v2258_v1 = vsub.f32 %v2060_v34, %v707_v30  ;;  %v2266_v13 = vsub.f32 %v2063_v36, %v692_v50 }
 0x295   : > { %v771_v28 = vmul.f32 %v2258_v1, %v2258_v1  ;;  %v756_v56 = vmul.f32 %v2266_v13, %v2266_v13 }
 0x297   : > { %v853_v17 = vsel %vm578_vm2, %v771_v28, 0.0  ;;  %v808_v16 = vsel %vm578_vm2, %v756_v56, 0.0 }
 0x298   : > { %v659_v44 = vpop.xlane.xlu1 %658  ;;  %v614_v26 = vpop.xlane.xlu2 %613  ;;  %854 = vadd.xlane.f32.xlu1 %v853_v17  ;;  %851 = vadd.xlane.f32.xlu2 %v850_v7 }
 0x299   : > { %v693_v34 = vmul.f32 %v2112_v21, %v614_v26  ;;  %v708_v9 = vmul.f32 %v2112_v21, %v659_v44 }
 0x29b   : > { %v2273_v32 = vsub.f32 %v2073_v43, %v693_v34  ;;  %v2280_v35 = vsub.f32 %v2070_v40, %v708_v9 }
 0x29d   : > { %v757_v36 = vmul.f32 %v2273_v32, %v2273_v32  ;;  %v772_v60 = vmul.f32 %v2280_v35, %v2280_v35 }
 0x29f   : > { %v811_v37 = vsel %vm578_vm2, %v757_v36, 0.0  ;;  %v856_v20 = vsel %vm578_vm2, %v772_v60, 0.0 }
 0x2a0   : > { %v662_v41 = vpop.xlane.xlu2 %661  ;;  %v617_v42 = vpop.xlane.xlu1 %616  ;;  %812 = vadd.xlane.f32.xlu1 %v811_v37  ;;  %809 = vadd.xlane.f32.xlu2 %v808_v16 }
 0x2a1   : > { %v709_v43 = vmul.f32 %v2112_v21, %v662_v41  ;;  %v694_v47 = vmul.f32 %v2112_v21, %v617_v42 }
 0x2a3   : > { %v2286_v14 = vsub.f32 %v2080_v51, %v709_v43  ;;  %v2294_v49 = vsub.f32 %v2083_v53, %v694_v47 }
 0x2a5   : > { %v773_v40 = vmul.f32 %v2286_v14, %v2286_v14  ;;  %v758_v4 = vmul.f32 %v2294_v49, %v2294_v49 }
 0x2a7   : > { %v859_v23 = vsel %vm578_vm2, %v773_v40, 0.0  ;;  %v814_v30 = vsel %vm578_vm2, %v758_v4, 0.0 }
 0x2a8   : > { %v665_v62 = vpop.xlane.xlu1 %664  ;;  %v620_v58 = vpop.xlane.xlu2 %619  ;;  %860 = vadd.xlane.f32.xlu1 %v859_v23  ;;  %857 = vadd.xlane.f32.xlu2 %v856_v20 }
 0x2a9   : > { %v695_v51 = vmul.f32 %v2112_v21, %v620_v58  ;;  %v710_v24 = vmul.f32 %v2112_v21, %v665_v62 }
 0x2ab   : > { %v2301_v0 = vsub.f32 %v2093_v2, %v695_v51  ;;  %v2308_v6 = vsub.f32 %v2090_v59, %v710_v24 }
 0x2ad   : > { %v759_v53 = vmul.f32 %v2301_v0, %v2301_v0  ;;  %v774_v7 = vmul.f32 %v2308_v6, %v2308_v6 }
 0x2af   : > { %v817_v48 = vsel %vm578_vm2, %v759_v53, 0.0  ;;  %v862_v34 = vsel %vm578_vm2, %v774_v7, 0.0 }
 0x2b0   : > { %v668_v50 = vpop.xlane.xlu2 %667  ;;  %818 = vadd.xlane.f32.xlu1 %v817_v48  ;;  %v623_v11 = vpop.xlane.xlu1 %622  ;;  %815 = vadd.xlane.f32.xlu2 %v814_v30 }
 0x2b1   : > { %v711_v2 = vmul.f32 %v2112_v21, %v668_v50  ;;  %v696_v17 = vmul.f32 %v2112_v21, %v623_v11 }
 0x2b3   : > { %v2314_v28 = vsub.f32 %v2100_v8, %v711_v2  ;;  %v2322_v44 = vsub.f32 %v2103_v12, %v696_v17 }
 0x2b5   : > { %v775_v59 = vmul.f32 %v2314_v28, %v2314_v28  ;;  %v760_v16 = vmul.f32 %v2322_v44, %v2322_v44 }
 0x2b7   : > { %v865_v26 = vsel %vm578_vm2, %v775_v59, 0.0  ;;  %v820_v42 = vsel %vm578_vm2, %v760_v16, 0.0 }
 0x2b8   : > { %866 = vadd.xlane.f32.xlu1 %v865_v26  ;;  %v671_v9 = vpop.xlane.xlu1 %670  ;;  %863 = vadd.xlane.f32.xlu2 %v862_v34  ;;  %v626_v8 = vpop.xlane.xlu2 %625 }
 0x2b9   : > { %v697_v56 = vmul.f32 %v2112_v21, %v626_v8  ;;  %v712_v36 = vmul.f32 %v2112_v21, %v671_v9 }
 0x2bb   : > { %v2329_v37 = vsub.f32 %v2116_v29, %v697_v56  ;;  %v2336_v41 = vsub.f32 %v2110_v19, %v712_v36 }
 0x2bd   : > { %v761_v12 = vmul.f32 %v2329_v37, %v2329_v37  ;;  %v776_v19 = vmul.f32 %v2336_v41, %v2336_v41 }
 0x2bf   : > { %v823_v43 = vsel %vm578_vm2, %v761_v12, 0.0  ;;  %v868_v58 = vsel %vm578_vm2, %v776_v19, 0.0 }
 0x2c0   : > { %v780_v47 = vpop.xlane.xlu1 %779  ;;  %821 = vadd.xlane.f32.xlu2 %v820_v42  ;;  %824 = vadd.xlane.f32.xlu1 %v823_v43  ;;  %v674_v60 = vpop.xlane.xlu2 %673  ;;  %v2366_v42 = vld [vmem:[%s2753_s3] ss:$0 sm:$0xff] }
 0x2c1   : > { %v874_v29 = vmul.f32 %v780_v47, %v2112_v21  ;;  %v713_v40 = vmul.f32 %v2112_v21, %v674_v60 }
 0x2c3   : > { %v906_v23 = vadd.f32 1e-05, %v874_v29  ;;  %v2343_v20 = vsub.f32 %v2126_v38, %v713_v40 }
 0x2c5   : > { %1625 = vrsqrt.f32 %v906_v23  ;;  %v777_v62 = vmul.f32 %v2343_v20, %v2343_v20  ;;  %vm944_vm5 = vweird.f32 %v906_v23 }
 0x2c7   : > { %v871_v51 = vsel %vm578_vm2, %v777_v62, 0.0 }
 0x2c8   : > { %v831_v24 = vpop.xlane.xlu1 %830  ;;  %869 = vadd.xlane.f32.xlu2 %v868_v58  ;;  %872 = vadd.xlane.f32.xlu1 %v871_v51 }
 0x2c9   : > { %v891_v4 = vmul.f32 %v831_v24, %v2112_v21 }
 0x2cb   : > { %v1626_v53 = vpop.eup %1625  ;;  %v923_v38 = vadd.f32 1e-05, %v891_v4  ;;  %v783_v48 = vpop.xlane.xlu2 %782 }
 0x2cc   : > { %v786_v30 = vpop.xlane.xlu0 %785  ;;  %v939_v50 = vmul.f32 %v1626_v53, %v906_v23  ;;  %v875_v11 = vmul.f32 %v783_v48, %v2112_v21  ;;  %vm945_vm4 = vweird.f32 %v1626_v53  ;;  %v2374_v23 = vld [vmem:[%s2754_s4] ss:$0 sm:$0xff] }
 0x2cd   : > { %v876_v2 = vmul.f32 %v786_v30, %v2112_v21  ;;  %1627 = vrsqrt.f32 %v923_v38  ;;  %vm946_vm6 = vmor %vm944_vm5, %vm945_vm4  ;;  %vm1114_vm8 = vweird.f32 %v923_v38 }
 0x2ce   : > { %v940_v17 = vmul.f32 %v1626_v53, %v939_v50  ;;  %v2354_v7 = vadd.f32 1e-05, %v875_v11 }
 0x2cf   : > { %v2356_v59 = vadd.f32 1e-05, %v876_v2 }
 0x2d0   : > { %v941_v26 = vmul.f32 0.5, %v940_v17  ;;  %1629 = vrsqrt.f32 %v2354_v7  ;;  %vm954_vm12 = vweird.f32 %v2354_v7 }
 0x2d1   : > { %1631 = vrsqrt.f32 %v2356_v59  ;;  %vm964_vm14 = vweird.f32 %v2356_v59 }
 0x2d2   : > { %v942_v34 = vsub.f32 1.5, %v941_v26 }
 0x2d3   : > { %v1628_v9 = vpop.eup %1627  ;;  %v789_v8 = vpop.xlane.xlu1 %788 }
 0x2d4   : > { %v828_v56 = vpop.xlane.xlu2 %827  ;;  %v943_v36 = vmul.f32 %v1626_v53, %v942_v34  ;;  %v1109_v16 = vmul.f32 %v1628_v9, %v923_v38  ;;  %v877_v12 = vmul.f32 %v789_v8, %v2112_v21  ;;  %vm1115_vm7 = vweird.f32 %v1628_v9 }
 0x2d5   : > { %v890_v43 = vmul.f32 %v828_v56, %v2112_v21  ;;  %vm1116_vm9 = vmor %vm1114_vm8, %vm1115_vm7 }
 0x2d6   : > { %v1630_v47 = vpop.eup %1629  ;;  %v947_v60 = vsel %vm946_vm6, %v1626_v53, %v943_v36  ;;  %v1110_v29 = vmul.f32 %v1628_v9, %v1109_v16  ;;  %v2369_v40 = vadd.f32 1e-05, %v877_v12 }
 0x2d7   : > { %v1632_v19 = vpop.eup %1631  ;;  %v1258_v62 = vmul.f32 %v947_v60, %v2119_v31  ;;  %v949_v58 = vmul.f32 %v1630_v47, %v2354_v7  ;;  %v2378_v51 = vadd.f32 1e-05, %v890_v43  ;;  %vm955_vm10 = vweird.f32 %v1630_v47 }
 0x2d8   : > { %v1111_v24 = vmul.f32 0.5, %v1110_v29  ;;  %v959_v4 = vmul.f32 %v1632_v19, %v2356_v59  ;;  %1633 = vrsqrt.f32 %v2369_v40  ;;  %vm965_vm11 = vweird.f32 %v1632_v19  ;;  %vm956_vm13 = vmor %vm954_vm12, %vm955_vm10 }
 0x2d9   : > { %v1294_v53 = vmul.f32 %v2366_v42, %v1258_v62  ;;  %v950_v48 = vmul.f32 %v1630_v47, %v949_v58  ;;  %1635 = vrsqrt.f32 %v2378_v51  ;;  %vm966_vm15 = vmor %vm964_vm14, %vm965_vm11  ;;  %vm974_vm3 = vweird.f32 %v2369_v40 }
 0x2da   : > { %v1112_v31 = vsub.f32 1.5, %v1111_v24  ;;  %v960_v30 = vmul.f32 %v1632_v19, %v959_v4  ;;  %vm1104_vm5 = vweird.f32 %v2378_v51 }
 0x2db   : > { %v1330_v50 = vadd.f32 %v2374_v23, %v1294_v53  ;;  %v951_v11 = vmul.f32 0.5, %v950_v48  ;;  %v837_v2 = vpop.xlane.xlu1 %836 }
 0x2dc   : > { %v834_v17 = vpop.xlane.xlu2 %833  ;;  %v1113_v26 = vmul.f32 %v1628_v9, %v1112_v31  ;;  %v961_v34 = vmul.f32 0.5, %v960_v30  ;;  %v893_v8 = vmul.f32 %v837_v2, %v2112_v21 }
 0x2dd   : > { %v892_v56 = vmul.f32 %v834_v17, %v2112_v21  ;;  %1362 = vst.msk [vmem:[%s2387_s17] sm:$0xff] %vm578_vm2, %v1330_v50  ;;  %v952_v36 = vsub.f32 1.5, %v951_v11 }
 0x2de   : > { %v1634_v16 = vpop.eup %1633  ;;  %v1117_v12 = vsel %vm1116_vm9, %v1628_v9, %v1113_v26  ;;  %v962_v43 = vsub.f32 1.5, %v961_v34  ;;  %v2394_v60 = vadd.f32 1e-05, %v893_v8 }
 0x2df   : > { %v2396_v38 = vadd.f32 1e-05, %v892_v56  ;;  %v1636_v29 = vpop.eup %1635  ;;  %v1275_v62 = vmul.f32 %v1117_v12, %v2132_v45  ;;  %v953_v58 = vmul.f32 %v1630_v47, %v952_v36  ;;  %v969_v24 = vmul.f32 %v1634_v16, %v2369_v40 }
 0x2e0   : > { %v963_v4 = vmul.f32 %v1632_v19, %v962_v43  ;;  %v1099_v53 = vmul.f32 %v1636_v29, %v2378_v51  ;;  %1637 = vrsqrt.f32 %v2394_v60  ;;  %vm975_vm0 = vweird.f32 %v1634_v16 }
 0x2e1   : > { %v1311_v9 = vmul.f32 %v2366_v42, %v1275_v62  ;;  %v957_v48 = vsel %vm956_vm13, %v1630_v47, %v953_v58  ;;  %v970_v45 = vmul.f32 %v1634_v16, %v969_v24  ;;  %1639 = vrsqrt.f32 %v2396_v38  ;;  %vm976_vm4 = vmor %vm974_vm3, %vm975_vm0 }
 0x2e2   : > { %v1259_v31 = vmul.f32 %v957_v48, %v2143_v25  ;;  %v967_v7 = vsel %vm966_vm15, %v1632_v19, %v963_v4  ;;  %v1100_v30 = vmul.f32 %v1636_v29, %v1099_v53  ;;  %vm1105_vm1 = vweird.f32 %v1636_v29 }
 0x2e3   : > { %v1347_v50 = vadd.f32 %v2374_v23, %v1311_v9  ;;  %v1260_v59 = vmul.f32 %v967_v7, %v2146_v61  ;;  %v971_v11 = vmul.f32 0.5, %v970_v45  ;;  %v795_v2 = vpop.xlane.xlu1 %794  ;;  %vm1106_vm6 = vmor %vm1104_vm5, %vm1105_vm1  ;;  %vm1134_vm7 = vweird.f32 %v2394_v60 }
 0x2e4   : > { %v792_v17 = vpop.xlane.xlu2 %791  ;;  %v1295_v26 = vmul.f32 %v2366_v42, %v1259_v31  ;;  %v1101_v47 = vmul.f32 0.5, %v1100_v30  ;;  %v879_v34 = vmul.f32 %v795_v2, %v2112_v21  ;;  %vm1124_vm11 = vweird.f32 %v2396_v38 }
 0x2e5   : > { %v878_v8 = vmul.f32 %v792_v17, %v2112_v21  ;;  %1379 = vst.msk [vmem:[%s2387_s17 + $0x88] sm:$0xff] %vm578_vm2, %v1347_v50  ;;  %v1296_v25 = vmul.f32 %v2366_v42, %v1260_v59  ;;  %v972_v19 = vsub.f32 1.5, %v971_v11 }
 0x2e6   : > { %v1638_v61 = vpop.eup %1637  ;;  %v1331_v56 = vadd.f32 %v2374_v23, %v1295_v26  ;;  %v1102_v36 = vsub.f32 1.5, %v1101_v47  ;;  %v2417_v12 = vadd.f32 1e-05, %v879_v34 }
 0x2e7   : > { %v2419_v43 = vadd.f32 1e-05, %v878_v8  ;;  %v1332_v62 = vadd.f32 %v2374_v23, %v1296_v25  ;;  %v973_v58 = vmul.f32 %v1634_v16, %v972_v19  ;;  %v1129_v24 = vmul.f32 %v1638_v61, %v2394_v60  ;;  %v1640_v4 = vpop.eup %1639 }
 0x2e8   : > { %1363 = vst.msk [vmem:[%s2387_s17 + $0x8] sm:$0xff] %vm578_vm2, %v1331_v56  ;;  %v1103_v53 = vmul.f32 %v1636_v29, %v1102_v36  ;;  %1641 = vrsqrt.f32 %v2417_v12  ;;  %v1119_v45 = vmul.f32 %v1640_v4, %v2396_v38  ;;  %vm1135_vm8 = vweird.f32 %v1638_v61 }
 0x2e9   : > { %1364 = vst.msk [vmem:[%s2387_s17 + $0x10] sm:$0xff] %vm578_vm2, %v1332_v62  ;;  %v977_v9 = vsel %vm976_vm4, %v1634_v16, %v973_v58  ;;  %v1130_v48 = vmul.f32 %v1638_v61, %v1129_v24  ;;  %1643 = vrsqrt.f32 %v2419_v43  ;;  %vm1125_vm9 = vweird.f32 %v1640_v4  ;;  %vm1136_vm10 = vmor %vm1134_vm7, %vm1135_vm8 }
 0x2ea   : > { %v1261_v40 = vmul.f32 %v977_v9, %v2161_v15  ;;  %v1107_v31 = vsel %vm1106_vm6, %v1636_v29, %v1103_v53  ;;  %v1120_v50 = vmul.f32 %v1640_v4, %v1119_v45  ;;  %vm1126_vm12 = vmor %vm1124_vm11, %vm1125_vm9  ;;  %vm994_vm13 = vweird.f32 %v2417_v12 }
 0x2eb   : > { %v1274_v7 = vmul.f32 %v1107_v31, %v2154_v5  ;;  %v1131_v30 = vmul.f32 0.5, %v1130_v48  ;;  %v843_v51 = vpop.xlane.xlu1 %842  ;;  %vm984_vm1 = vweird.f32 %v2419_v43 }
 0x2ec   : > { %v840_v59 = vpop.xlane.xlu2 %839  ;;  %v1297_v11 = vmul.f32 %v2366_v42, %v1261_v40  ;;  %v895_v16 = vmul.f32 %v843_v51, %v2112_v21  ;;  %v1121_v17 = vmul.f32 0.5, %v1120_v50 }
 0x2ed   : > { %v894_v2 = vmul.f32 %v840_v59, %v2112_v21  ;;  %v1310_v15 = vmul.f32 %v2366_v42, %v1274_v7  ;;  %v1132_v29 = vsub.f32 1.5, %v1131_v30 }
 0x2ee   : > { %v1642_v5 = vpop.eup %1641  ;;  %v1333_v26 = vadd.f32 %v2374_v23, %v1297_v11  ;;  %v2441_v47 = vadd.f32 1e-05, %v895_v16  ;;  %v1122_v19 = vsub.f32 1.5, %v1121_v17 }
 0x2ef   : > { %v2443_v34 = vadd.f32 1e-05, %v894_v2  ;;  %v1346_v8 = vadd.f32 %v2374_v23, %v1310_v15  ;;  %v1133_v25 = vmul.f32 %v1638_v61, %v1132_v29  ;;  %v989_v56 = vmul.f32 %v1642_v5, %v2417_v12  ;;  %v1644_v36 = vpop.eup %1643 }
 0x2f0   : > { %1365 = vst.msk [vmem:[%s2387_s17 + $0x18] sm:$0xff] %vm578_vm2, %v1333_v26  ;;  %1645 = vrsqrt.f32 %v2441_v47  ;;  %v1123_v58 = vmul.f32 %v1640_v4, %v1122_v19  ;;  %v979_v53 = vmul.f32 %v1644_v36, %v2419_v43  ;;  %vm995_vm14 = vweird.f32 %v1642_v5 }
 0x2f1   : > { %1378 = vst.msk [vmem:[%s2387_s17 + $0x80] sm:$0xff] %vm578_vm2, %v1346_v8  ;;  %v1137_v62 = vsel %vm1136_vm10, %v1638_v61, %v1133_v25  ;;  %v990_v24 = vmul.f32 %v1642_v5, %v989_v56  ;;  %1647 = vrsqrt.f32 %v2443_v34  ;;  %vm985_vm15 = vweird.f32 %v1644_v36  ;;  %vm996_vm0 = vmor %vm994_vm13, %vm995_vm14 }
 0x2f2   : > { %v1277_v9 = vmul.f32 %v1137_v62, %v2174_v33  ;;  %v1127_v48 = vsel %vm1126_vm12, %v1640_v4, %v1123_v58  ;;  %v980_v45 = vmul.f32 %v1644_v36, %v979_v53  ;;  %vm986_vm3 = vmor %vm984_vm1, %vm985_vm15  ;;  %vm1154_vm4 = vweird.f32 %v2441_v47 }
 0x2f3   : > { %v991_v60 = vmul.f32 0.5, %v990_v24  ;;  %v801_v40 = vpop.xlane.xlu1 %800  ;;  %v1276_v7 = vmul.f32 %v1127_v48, %v2168_v18  ;;  %vm1144_vm8 = vweird.f32 %v2443_v34 }
 0x2f4   : > { %v798_v38 = vpop.xlane.xlu2 %797  ;;  %v1313_v31 = vmul.f32 %v2366_v42, %v1277_v9  ;;  %v881_v61 = vmul.f32 %v801_v40, %v2112_v21  ;;  %v981_v33 = vmul.f32 0.5, %v980_v45 }
 0x2f5   : > { %v880_v30 = vmul.f32 %v798_v38, %v2112_v21  ;;  %v992_v50 = vsub.f32 1.5, %v991_v60  ;;  %v1312_v59 = vmul.f32 %v2366_v42, %v1276_v7 }
 0x2f6   : > { %v1646_v51 = vpop.eup %1645  ;;  %v1349_v4 = vadd.f32 %v2374_v23, %v1313_v31  ;;  %v2466_v11 = vadd.f32 1e-05, %v881_v61  ;;  %v982_v2 = vsub.f32 1.5, %v981_v33 }
 0x2f7   : > { %v2468_v16 = vadd.f32 1e-05, %v880_v30  ;;  %v993_v18 = vmul.f32 %v1642_v5, %v992_v50  ;;  %v1149_v15 = vmul.f32 %v1646_v51, %v2441_v47  ;;  %v1648_v29 = vpop.eup %1647  ;;  %v1348_v17 = vadd.f32 %v2374_v23, %v1312_v59 }
 0x2f8   : > { %1381 = vst.msk [vmem:[%s2387_s17 + $0x98] sm:$0xff] %vm578_vm2, %v1349_v4  ;;  %1649 = vrsqrt.f32 %v2466_v11  ;;  %v983_v8 = vmul.f32 %v1644_v36, %v982_v2  ;;  %v1139_v19 = vmul.f32 %v1648_v29, %v2443_v34  ;;  %vm1155_vm5 = vweird.f32 %v1646_v51 }
 0x2f9   : > { %v997_v26 = vsel %vm996_vm0, %v1642_v5, %v993_v18  ;;  %v1150_v25 = vmul.f32 %v1646_v51, %v1149_v15  ;;  %1380 = vst.msk [vmem:[%s2387_s17 + $0x90] sm:$0xff] %vm578_vm2, %v1348_v17  ;;  %1651 = vrsqrt.f32 %v2468_v16  ;;  %vm1145_vm6 = vweird.f32 %v1648_v29  ;;  %vm1156_vm7 = vmor %vm1154_vm4, %vm1155_vm5 }
 0x2fa   : > { %v1263_v56 = vmul.f32 %v997_v26, %v2189_v52  ;;  %v987_v62 = vsel %vm986_vm3, %v1644_v36, %v983_v8  ;;  %v1140_v12 = vmul.f32 %v1648_v29, %v1139_v19  ;;  %vm1146_vm9 = vmor %vm1144_vm8, %vm1145_vm6  ;;  %vm1014_vm10 = vweird.f32 %v2466_v11 }
 0x2fb   : > { %v1151_v58 = vmul.f32 0.5, %v1150_v25  ;;  %v849_v24 = vpop.xlane.xlu1 %848  ;;  %v1262_v5 = vmul.f32 %v987_v62, %v2182_v39  ;;  %vm1004_vm14 = vweird.f32 %v2468_v16 }
 0x2fc   : > { %v846_v53 = vpop.xlane.xlu2 %845  ;;  %v1299_v43 = vmul.f32 %v2366_v42, %v1263_v56  ;;  %v897_v9 = vmul.f32 %v849_v24, %v2112_v21  ;;  %v1141_v52 = vmul.f32 0.5, %v1140_v12 }
 0x2fd   : > { %v896_v48 = vmul.f32 %v846_v53, %v2112_v21  ;;  %v1152_v60 = vsub.f32 1.5, %v1151_v58  ;;  %v1298_v40 = vmul.f32 %v2366_v42, %v1262_v5 }
 0x2fe   : > { %v1650_v45 = vpop.eup %1649  ;;  %v1335_v36 = vadd.f32 %v2374_v23, %v1299_v43  ;;  %v2490_v38 = vadd.f32 1e-05, %v897_v9  ;;  %v1142_v7 = vsub.f32 1.5, %v1141_v52 }
 0x2ff   : > { %v2492_v31 = vadd.f32 1e-05, %v896_v48  ;;  %v1153_v39 = vmul.f32 %v1646_v51, %v1152_v60  ;;  %v1009_v61 = vmul.f32 %v1650_v45, %v2466_v11  ;;  %v1652_v30 = vpop.eup %1651  ;;  %v1334_v50 = vadd.f32 %v2374_v23, %v1298_v40 }
 0x300   : > { %1367 = vst.msk [vmem:[%s2387_s17 + $0x28] sm:$0xff] %vm578_vm2, %v1335_v36  ;;  %1653 = vrsqrt.f32 %v2490_v38  ;;  %v1143_v4 = vmul.f32 %v1648_v29, %v1142_v7  ;;  %v999_v18 = vmul.f32 %v1652_v30, %v2468_v16  ;;  %vm1015_vm11 = vweird.f32 %v1650_v45 }
 0x301   : > { %v1157_v33 = vsel %vm1156_vm7, %v1646_v51, %v1153_v39  ;;  %v1010_v59 = vmul.f32 %v1650_v45, %v1009_v61  ;;  %1366 = vst.msk [vmem:[%s2387_s17 + $0x20] sm:$0xff] %vm578_vm2, %v1334_v50  ;;  %1655 = vrsqrt.f32 %v2492_v31  ;;  %vm1005_vm12 = vweird.f32 %v1652_v30  ;;  %vm1016_vm13 = vmor %vm1014_vm10, %vm1015_vm11 }
 0x302   : > { %v1279_v2 = vmul.f32 %v1157_v33, %v2202_v3  ;;  %v1147_v15 = vsel %vm1146_vm9, %v1648_v29, %v1143_v4  ;;  %v1000_v47 = vmul.f32 %v1652_v30, %v999_v18  ;;  %vm1006_vm15 = vmor %vm1004_vm14, %vm1005_vm12  ;;  %vm1174_vm0 = vweird.f32 %v2490_v38 }
 0x303   : > { %v1011_v17 = vmul.f32 0.5, %v1010_v59  ;;  %v807_v26 = vpop.xlane.xlu1 %806  ;;  %v1278_v51 = vmul.f32 %v1147_v15, %v2196_v55  ;;  %vm1164_vm5 = vweird.f32 %v2492_v31 }
 0x304   : > { %v804_v8 = vpop.xlane.xlu2 %803  ;;  %v1315_v34 = vmul.f32 %v2366_v42, %v1279_v2  ;;  %v883_v25 = vmul.f32 %v807_v26, %v2112_v21  ;;  %v1001_v3 = vmul.f32 0.5, %v1000_v47 }
 0x305   : > { %v882_v19 = vmul.f32 %v804_v8, %v2112_v21  ;;  %v1012_v56 = vsub.f32 1.5, %v1011_v17  ;;  %v1314_v58 = vmul.f32 %v2366_v42, %v1278_v51 }
 0x306   : > { %v1654_v62 = vpop.eup %1653  ;;  %v1351_v29 = vadd.f32 %v2374_v23, %v1315_v34  ;;  %v2514_v12 = vadd.f32 1e-05, %v883_v25  ;;  %v1002_v53 = vsub.f32 1.5, %v1001_v3 }
 0x307   : > { %v2516_v24 = vadd.f32 1e-05, %v882_v19  ;;  %v1013_v55 = vmul.f32 %v1650_v45, %v1012_v56  ;;  %v1169_v43 = vmul.f32 %v1654_v62, %v2490_v38  ;;  %v1656_v5 = vpop.eup %1655  ;;  %v1350_v9 = vadd.f32 %v2374_v23, %v1314_v58 }
 0x308   : > { %1383 = vst.msk [vmem:[%s2387_s17 + $0xa8] sm:$0xff] %vm578_vm2, %v1351_v29  ;;  %1657 = vrsqrt.f32 %v2514_v12  ;;  %v1003_v60 = vmul.f32 %v1652_v30, %v1002_v53  ;;  %v1159_v36 = vmul.f32 %v1656_v5, %v2492_v31  ;;  %vm1175_vm1 = vweird.f32 %v1654_v62 }
 0x309   : > { %v1017_v48 = vsel %vm1016_vm13, %v1650_v45, %v1013_v55  ;;  %v1170_v52 = vmul.f32 %v1654_v62, %v1169_v43  ;;  %1382 = vst.msk [vmem:[%s2387_s17 + $0xa0] sm:$0xff] %vm578_vm2, %v1350_v9  ;;  %1659 = vrsqrt.f32 %v2516_v24  ;;  %vm1165_vm3 = vweird.f32 %v1656_v5  ;;  %vm1176_vm4 = vmor %vm1174_vm0, %vm1175_vm1 }
 0x30a   : > { %v1265_v40 = vmul.f32 %v1017_v48, %v2217_v22  ;;  %v1007_v39 = vsel %vm1006_vm15, %v1652_v30, %v1003_v60  ;;  %v1160_v11 = vmul.f32 %v1656_v5, %v1159_v36  ;;  %vm1166_vm6 = vmor %vm1164_vm5, %vm1165_vm3  ;;  %vm1034_vm7 = vweird.f32 %v2514_v12 }
 0x30b   : > { %v1171_v7 = vmul.f32 0.5, %v1170_v52  ;;  %v855_v61 = vpop.xlane.xlu1 %854  ;;  %v1264_v45 = vmul.f32 %v1007_v39, %v2210_v10  ;;  %vm1024_vm11 = vweird.f32 %v2516_v24 }
 0x30c   : > { %v852_v50 = vpop.xlane.xlu2 %851  ;;  %v1301_v16 = vmul.f32 %v2366_v42, %v1265_v40  ;;  %v899_v33 = vmul.f32 %v855_v61, %v2112_v21  ;;  %v1161_v22 = vmul.f32 0.5, %v1160_v11 }
 0x30d   : > { %v898_v4 = vmul.f32 %v852_v50, %v2112_v21  ;;  %v1172_v59 = vsub.f32 1.5, %v1171_v7  ;;  %v1300_v2 = vmul.f32 %v2366_v42, %v1264_v45 }
 0x30e   : > { %v1658_v18 = vpop.eup %1657  ;;  %v1337_v30 = vadd.f32 %v2374_v23, %v1301_v16  ;;  %v2538_v15 = vadd.f32 1e-05, %v899_v33  ;;  %v1162_v47 = vsub.f32 1.5, %v1161_v22 }
 0x30f   : > { %v2540_v17 = vadd.f32 1e-05, %v898_v4  ;;  %v1173_v10 = vmul.f32 %v1654_v62, %v1172_v59  ;;  %v1029_v26 = vmul.f32 %v1658_v18, %v2514_v12  ;;  %v1660_v8 = vpop.eup %1659  ;;  %v1336_v34 = vadd.f32 %v2374_v23, %v1300_v2 }
 0x310   : > { %1369 = vst.msk [vmem:[%s2387_s17 + $0x38] sm:$0xff] %vm578_vm2, %v1337_v30  ;;  %1661 = vrsqrt.f32 %v2538_v15  ;;  %v1163_v25 = vmul.f32 %v1656_v5, %v1162_v47  ;;  %v1019_v56 = vmul.f32 %v1660_v8, %v2516_v24  ;;  %vm1035_vm8 = vweird.f32 %v1658_v18 }
 0x311   : > { %v1177_v51 = vsel %vm1176_vm4, %v1654_v62, %v1173_v10  ;;  %v1030_v19 = vmul.f32 %v1658_v18, %v1029_v26  ;;  %1368 = vst.msk [vmem:[%s2387_s17 + $0x30] sm:$0xff] %vm578_vm2, %v1336_v34  ;;  %1663 = vrsqrt.f32 %v2540_v17  ;;  %vm1025_vm9 = vweird.f32 %v1660_v8  ;;  %vm1036_vm10 = vmor %vm1034_vm7, %vm1035_vm8 }
 0x312   : > { %v1281_v3 = vmul.f32 %v1177_v51, %v2230_v54  ;;  %v1167_v29 = vsel %vm1166_vm6, %v1656_v5, %v1163_v25  ;;  %v1020_v38 = vmul.f32 %v1660_v8, %v1019_v56  ;;  %vm1026_vm12 = vmor %vm1024_vm11, %vm1025_vm9  ;;  %vm1194_vm13 = vweird.f32 %v2538_v15 }
 0x313   : > { %v1031_v58 = vmul.f32 0.5, %v1030_v19  ;;  %v813_v55 = vpop.xlane.xlu1 %812  ;;  %v1280_v62 = vmul.f32 %v1167_v29, %v2224_v27  ;;  %vm1184_vm1 = vweird.f32 %v2540_v17 }
 0x314   : > { %v810_v53 = vpop.xlane.xlu2 %809  ;;  %v1317_v31 = vmul.f32 %v2366_v42, %v1281_v3  ;;  %v885_v43 = vmul.f32 %v813_v55, %v2112_v21  ;;  %v1021_v54 = vmul.f32 0.5, %v1020_v38 }
 0x315   : > { %v884_v9 = vmul.f32 %v810_v53, %v2112_v21  ;;  %v1032_v48 = vsub.f32 1.5, %v1031_v58  ;;  %v1316_v52 = vmul.f32 %v2366_v42, %v1280_v62 }
 0x316   : > { %v1662_v60 = vpop.eup %1661  ;;  %v1353_v5 = vadd.f32 %v2374_v23, %v1317_v31  ;;  %v2562_v36 = vadd.f32 1e-05, %v885_v43  ;;  %v1022_v39 = vsub.f32 1.5, %v1021_v54 }
 0x317   : > { %v2564_v40 = vadd.f32 1e-05, %v884_v9  ;;  %v1033_v27 = vmul.f32 %v1658_v18, %v1032_v48  ;;  %v1189_v7 = vmul.f32 %v1662_v60, %v2538_v15  ;;  %v1664_v11 = vpop.eup %1663  ;;  %v1352_v61 = vadd.f32 %v2374_v23, %v1316_v52 }
 0x318   : > { %1385 = vst.msk [vmem:[%s2387_s17 + $0xb8] sm:$0xff] %vm578_vm2, %v1353_v5  ;;  %1665 = vrsqrt.f32 %v2562_v36  ;;  %v1023_v16 = vmul.f32 %v1660_v8, %v1022_v39  ;;  %v1179_v33 = vmul.f32 %v1664_v11, %v2540_v17  ;;  %vm1195_vm14 = vweird.f32 %v1662_v60 }
 0x319   : > { %v1037_v50 = vsel %vm1036_vm10, %v1658_v18, %v1033_v27  ;;  %v1190_v45 = vmul.f32 %v1662_v60, %v1189_v7  ;;  %1384 = vst.msk [vmem:[%s2387_s17 + $0xb0] sm:$0xff] %vm578_vm2, %v1352_v61  ;;  %1667 = vrsqrt.f32 %v2564_v40  ;;  %vm1185_vm15 = vweird.f32 %v1664_v11  ;;  %vm1196_vm0 = vmor %vm1194_vm13, %vm1195_vm14 }
 0x31a   : > { %v1267_v4 = vmul.f32 %v1037_v50, %v2245_v57  ;;  %v1027_v59 = vsel %vm1026_vm12, %v1660_v8, %v1023_v16  ;;  %v1180_v12 = vmul.f32 %v1664_v11, %v1179_v33  ;;  %vm1186_vm3 = vmor %vm1184_vm1, %vm1185_vm15  ;;  %vm1054_vm4 = vweird.f32 %v2562_v36 }
 0x31b   : > { %v1191_v22 = vmul.f32 0.5, %v1190_v45  ;;  %v861_v30 = vpop.xlane.xlu1 %860  ;;  %v1266_v18 = vmul.f32 %v1027_v59, %v2238_v46  ;;  %vm1044_vm8 = vweird.f32 %v2564_v40 }
 0x31c   : > { %v858_v2 = vpop.xlane.xlu2 %857  ;;  %v1303_v24 = vmul.f32 %v2366_v42, %v1267_v4  ;;  %v901_v10 = vmul.f32 %v861_v30, %v2112_v21  ;;  %v1181_v57 = vmul.f32 0.5, %v1180_v12 }
 0x31d   : > { %v900_v47 = vmul.f32 %v858_v2, %v2112_v21  ;;  %v1192_v26 = vsub.f32 1.5, %v1191_v22  ;;  %v1302_v51 = vmul.f32 %v2366_v42, %v1266_v18 }
 0x31e   : > { %v1666_v34 = vpop.eup %1665  ;;  %v1339_v8 = vadd.f32 %v2374_v23, %v1303_v24  ;;  %v2586_v25 = vadd.f32 1e-05, %v901_v10  ;;  %v1182_v56 = vsub.f32 1.5, %v1181_v57 }
 0x31f   : > { %v2588_v19 = vadd.f32 1e-05, %v900_v47  ;;  %v1193_v46 = vmul.f32 %v1662_v60, %v1192_v26  ;;  %v1049_v3 = vmul.f32 %v1666_v34, %v2562_v36  ;;  %v1668_v29 = vpop.eup %1667  ;;  %v1338_v58 = vadd.f32 %v2374_v23, %v1302_v51 }
 0x320   : > { %1371 = vst.msk [vmem:[%s2387_s17 + $0x48] sm:$0xff] %vm578_vm2, %v1339_v8  ;;  %1669 = vrsqrt.f32 %v2586_v25  ;;  %v1183_v55 = vmul.f32 %v1664_v11, %v1182_v56  ;;  %v1039_v31 = vmul.f32 %v1668_v29, %v2564_v40  ;;  %vm1055_vm5 = vweird.f32 %v1666_v34 }
 0x321   : > { %v1197_v38 = vsel %vm1196_vm0, %v1662_v60, %v1193_v46  ;;  %v1050_v53 = vmul.f32 %v1666_v34, %v1049_v3  ;;  %1370 = vst.msk [vmem:[%s2387_s17 + $0x40] sm:$0xff] %vm578_vm2, %v1338_v58  ;;  %1671 = vrsqrt.f32 %v2588_v19  ;;  %vm1045_vm6 = vweird.f32 %v1668_v29  ;;  %vm1056_vm7 = vmor %vm1054_vm4, %vm1055_vm5 }
 0x322   : > { %v1283_v62 = vmul.f32 %v1197_v38, %v2258_v1  ;;  %v1187_v43 = vsel %vm1186_vm3, %v1664_v11, %v1183_v55  ;;  %v1040_v15 = vmul.f32 %v1668_v29, %v1039_v31  ;;  %vm1046_vm9 = vmor %vm1044_vm8, %vm1045_vm6  ;;  %vm1214_vm10 = vweird.f32 %v2586_v25 }
 0x323   : > { %v1051_v9 = vmul.f32 0.5, %v1050_v53  ;;  %v819_v48 = vpop.xlane.xlu1 %818  ;;  %v1282_v60 = vmul.f32 %v1187_v43, %v2252_v63  ;;  %vm1204_vm14 = vweird.f32 %v2588_v19 }
 0x324   : > { %v816_v54 = vpop.xlane.xlu2 %815  ;;  %v1319_v17 = vmul.f32 %v2366_v42, %v1283_v62  ;;  %v887_v5 = vmul.f32 %v819_v48, %v2112_v21  ;;  %v1041_v1 = vmul.f32 0.5, %v1040_v15 }
 0x325   : > { %v886_v52 = vmul.f32 %v816_v54, %v2112_v21  ;;  %v1052_v27 = vsub.f32 1.5, %v1051_v9  ;;  %v1318_v11 = vmul.f32 %v2366_v42, %v1282_v60 }
 0x326   : > { %v1670_v39 = vpop.eup %1669  ;;  %v1355_v7 = vadd.f32 %v2374_v23, %v1319_v17  ;;  %v2610_v61 = vadd.f32 1e-05, %v887_v5  ;;  %v1042_v16 = vsub.f32 1.5, %v1041_v1 }
 0x327   : > { %v2612_v50 = vadd.f32 1e-05, %v886_v52  ;;  %v1053_v63 = vmul.f32 %v1666_v34, %v1052_v27  ;;  %v1209_v45 = vmul.f32 %v1670_v39, %v2586_v25  ;;  %v1672_v33 = vpop.eup %1671  ;;  %v1354_v4 = vadd.f32 %v2374_v23, %v1318_v11 }
 0x328   : > { %1387 = vst.msk [vmem:[%s2387_s17 + $0xc8] sm:$0xff] %vm578_vm2, %v1355_v7  ;;  %1673 = vrsqrt.f32 %v2610_v61  ;;  %v1043_v22 = vmul.f32 %v1668_v29, %v1042_v16  ;;  %v1199_v30 = vmul.f32 %v1672_v33, %v2588_v19  ;;  %vm1215_vm11 = vweird.f32 %v1670_v39 }
 0x329   : > { %v1057_v59 = vsel %vm1056_vm7, %v1666_v34, %v1053_v63  ;;  %v1210_v12 = vmul.f32 %v1670_v39, %v1209_v45  ;;  %1386 = vst.msk [vmem:[%s2387_s17 + $0xc0] sm:$0xff] %vm578_vm2, %v1354_v4  ;;  %1675 = vrsqrt.f32 %v2612_v50  ;;  %vm1205_vm12 = vweird.f32 %v1672_v33  ;;  %vm1216_vm13 = vmor %vm1214_vm10, %vm1215_vm11 }
 0x32a   : > { %v1269_v2 = vmul.f32 %v1057_v59, %v2273_v32  ;;  %v1047_v24 = vsel %vm1046_vm9, %v1668_v29, %v1043_v22  ;;  %v1200_v36 = vmul.f32 %v1672_v33, %v1199_v30  ;;  %vm1206_vm15 = vmor %vm1204_vm14, %vm1205_vm12  ;;  %vm1074_vm0 = vweird.f32 %v2610_v61 }
 0x32b   : > { %v1211_v18 = vmul.f32 0.5, %v1210_v12  ;;  %v867_v10 = vpop.xlane.xlu1 %866  ;;  %v1268_v26 = vmul.f32 %v1047_v24, %v2266_v13  ;;  %vm1064_vm5 = vweird.f32 %v2612_v50 }
 0x32c   : > { %v864_v47 = vpop.xlane.xlu2 %863  ;;  %v1305_v40 = vmul.f32 %v2366_v42, %v1269_v2  ;;  %v903_v57 = vmul.f32 %v867_v10, %v2112_v21  ;;  %v1201_v32 = vmul.f32 0.5, %v1200_v36 }
 0x32d   : > { %v902_v34 = vmul.f32 %v864_v47, %v2112_v21  ;;  %v1212_v8 = vsub.f32 1.5, %v1211_v18  ;;  %v1304_v56 = vmul.f32 %v2366_v42, %v1268_v26 }
 0x32e   : > { %v1674_v51 = vpop.eup %1673  ;;  %v1341_v46 = vadd.f32 %v2374_v23, %v1305_v40  ;;  %v2634_v3 = vadd.f32 1e-05, %v903_v57  ;;  %v1202_v58 = vsub.f32 1.5, %v1201_v32 }
 0x32f   : > { %v2636_v29 = vadd.f32 1e-05, %v902_v34  ;;  %v1213_v13 = vmul.f32 %v1670_v39, %v1212_v8  ;;  %v1069_v38 = vmul.f32 %v1674_v51, %v2610_v61  ;;  %v1676_v55 = vpop.eup %1675  ;;  %v1340_v53 = vadd.f32 %v2374_v23, %v1304_v56 }
 0x330   : > { %1373 = vst.msk [vmem:[%s2387_s17 + $0x58] sm:$0xff] %vm578_vm2, %v1341_v46  ;;  %1677 = vrsqrt.f32 %v2634_v3  ;;  %v1203_v62 = vmul.f32 %v1672_v33, %v1202_v58  ;;  %v1059_v9 = vmul.f32 %v1676_v55, %v2612_v50  ;;  %vm1075_vm1 = vweird.f32 %v1674_v51 }
 0x331   : > { %v1217_v31 = vsel %vm1216_vm13, %v1670_v39, %v1213_v13  ;;  %v1070_v43 = vmul.f32 %v1674_v51, %v1069_v38  ;;  %1372 = vst.msk [vmem:[%s2387_s17 + $0x50] sm:$0xff] %vm578_vm2, %v1340_v53  ;;  %1679 = vrsqrt.f32 %v2636_v29  ;;  %vm1065_vm3 = vweird.f32 %v1676_v55  ;;  %vm1076_vm4 = vmor %vm1074_vm0, %vm1075_vm1 }
 0x332   : > { %v1285_v15 = vmul.f32 %v1217_v31, %v2286_v14  ;;  %v1207_v48 = vsel %vm1206_vm15, %v1672_v33, %v1203_v62  ;;  %v1060_v25 = vmul.f32 %v1676_v55, %v1059_v9  ;;  %vm1066_vm6 = vmor %vm1064_vm5, %vm1065_vm3  ;;  %vm1234_vm7 = vweird.f32 %v2634_v3 }
 0x333   : > { %v1071_v54 = vmul.f32 0.5, %v1070_v43  ;;  %v825_v17 = vpop.xlane.xlu1 %824  ;;  %v1284_v5 = vmul.f32 %v1207_v48, %v2280_v35  ;;  %vm1224_vm11 = vweird.f32 %v2636_v29 }
 0x334   : > { %v822_v60 = vpop.xlane.xlu2 %821  ;;  %v1321_v19 = vmul.f32 %v2366_v42, %v1285_v15  ;;  %v889_v52 = vmul.f32 %v825_v17, %v2112_v21  ;;  %v1061_v14 = vmul.f32 0.5, %v1060_v25 }
 0x335   : > { %v888_v27 = vmul.f32 %v822_v60, %v2112_v21  ;;  %v1072_v1 = vsub.f32 1.5, %v1071_v54  ;;  %v1320_v11 = vmul.f32 %v2366_v42, %v1284_v5 }
 0x336   : > { %v1678_v39 = vpop.eup %1677  ;;  %v1357_v7 = vadd.f32 %v2374_v23, %v1321_v19  ;;  %v2658_v63 = vadd.f32 1e-05, %v889_v52  ;;  %v1062_v45 = vsub.f32 1.5, %v1061_v14 }
 0x337   : > { %v2660_v16 = vadd.f32 1e-05, %v888_v27  ;;  %v1073_v35 = vmul.f32 %v1674_v51, %v1072_v1  ;;  %v1229_v33 = vmul.f32 %v1678_v39, %v2634_v3  ;;  %v1680_v4 = vpop.eup %1679  ;;  %v1356_v59 = vadd.f32 %v2374_v23, %v1320_v11 }
 0x338   : > { %1389 = vst.msk [vmem:[%s2387_s17 + $0xd8] sm:$0xff] %vm578_vm2, %v1357_v7  ;;  %1681 = vrsqrt.f32 %v2658_v63  ;;  %v1063_v12 = vmul.f32 %v1676_v55, %v1062_v45  ;;  %v1219_v2 = vmul.f32 %v1680_v4, %v2636_v29  ;;  %vm1235_vm8 = vweird.f32 %v1678_v39 }
 0x339   : > { %v1077_v22 = vsel %vm1076_vm4, %v1674_v51, %v1073_v35  ;;  %v1230_v30 = vmul.f32 %v1678_v39, %v1229_v33  ;;  %1388 = vst.msk [vmem:[%s2387_s17 + $0xd0] sm:$0xff] %vm578_vm2, %v1356_v59  ;;  %1683 = vrsqrt.f32 %v2660_v16  ;;  %vm1225_vm9 = vweird.f32 %v1680_v4  ;;  %vm1236_vm10 = vmor %vm1234_vm7, %vm1235_vm8 }
 0x33a   : > { %v1271_v24 = vmul.f32 %v1077_v22, %v2301_v0  ;;  %v1067_v18 = vsel %vm1066_vm6, %v1676_v55, %v1063_v12  ;;  %v1220_v61 = vmul.f32 %v1680_v4, %v1219_v2  ;;  %vm1226_vm12 = vmor %vm1224_vm11, %vm1225_vm9  ;;  %vm1094_vm14 = vweird.f32 %v2658_v63 }
 0x33b   : > { %v1231_v36 = vmul.f32 0.5, %v1230_v30  ;;  %v873_v10 = vpop.xlane.xlu1 %872  ;;  %v1270_v40 = vmul.f32 %v1067_v18, %v2294_v49  ;;  %vm1084_vm1 = vweird.f32 %v2660_v16 }
 0x33c   : > { %v870_v47 = vpop.xlane.xlu2 %869  ;;  %v1307_v50 = vmul.f32 %v2366_v42, %v1271_v24  ;;  %v905_v26 = vmul.f32 %v873_v10, %v2112_v21  ;;  %v1221_v0 = vmul.f32 0.5, %v1220_v61 }
 0x33d   : > { %v904_v57 = vmul.f32 %v870_v47, %v2112_v21  ;;  %v1232_v34 = vsub.f32 1.5, %v1231_v36  ;;  %v1306_v51 = vmul.f32 %v2366_v42, %v1270_v40 }
 0x33e   : > { %v1682_v8 = vpop.eup %1681  ;;  %v1343_v32 = vadd.f32 %v2374_v23, %v1307_v50  ;;  %v2682_v46 = vadd.f32 1e-05, %v905_v26  ;;  %v1222_v13 = vsub.f32 1.5, %v1221_v0 }
 0x33f   : > { %v2684_v56 = vadd.f32 1e-05, %v904_v57  ;;  %v1233_v49 = vmul.f32 %v1678_v39, %v1232_v34  ;;  %v1089_v21 = vmul.f32 %v1682_v8, %v2658_v63  ;;  %v1684_v58 = vpop.eup %1683  ;;  %v1342_v38 = vadd.f32 %v2374_v23, %v1306_v51 }
 0x340   : > { %1375 = vst.msk [vmem:[%s2387_s17 + $0x68] sm:$0xff] %vm578_vm2, %v1343_v32  ;;  %1685 = vrsqrt.f32 %v2682_v46  ;;  %v1223_v53 = vmul.f32 %v1680_v4, %v1222_v13  ;;  %v1079_v62 = vmul.f32 %v1684_v58, %v2660_v16  ;;  %vm1095_vm13 = vweird.f32 %v1682_v8 }
 0x341   : > { %v1237_v55 = vsel %vm1236_vm10, %v1678_v39, %v1233_v49  ;;  %v1090_v31 = vmul.f32 %v1682_v8, %v1089_v21  ;;  %1374 = vst.msk [vmem:[%s2387_s17 + $0x60] sm:$0xff] %vm578_vm2, %v1342_v38  ;;  %1687 = vrsqrt.f32 %v2684_v56  ;;  %vm1085_vm15 = vweird.f32 %v1684_v58  ;;  %vm1096_vm0 = vmor %vm1094_vm14, %vm1095_vm13 }
 0x342   : > { %v1287_v43 = vmul.f32 %v1237_v55, %v2314_v28  ;;  %v1227_v9 = vsel %vm1226_vm12, %v1680_v4, %v1223_v53  ;;  %v1080_v3 = vmul.f32 %v1684_v58, %v1079_v62  ;;  %vm1086_vm3 = vmor %vm1084_vm1, %vm1085_vm15  ;;  %vm1254_vm5 = vweird.f32 %v2682_v46 }
 0x343   : > { %v1091_v15 = vmul.f32 0.5, %v1090_v31  ;;  %v1286_v48 = vmul.f32 %v1227_v9, %v2308_v6  ;;  %vm1244_vm8 = vweird.f32 %v2684_v56 }
 0x344   : > { %v1323_v29 = vmul.f32 %v2366_v42, %v1287_v43  ;;  %v1081_v25 = vmul.f32 0.5, %v1080_v3 }
 0x345   : > { %v1092_v54 = vsub.f32 1.5, %v1091_v15  ;;  %v1322_v28 = vmul.f32 %v2366_v42, %v1286_v48 }
 0x346   : > { %v1686_v17 = vpop.eup %1685  ;;  %v1359_v60 = vadd.f32 %v2374_v23, %v1323_v29  ;;  %v1082_v5 = vsub.f32 1.5, %v1081_v25 }
 0x347   : > { %v1093_v19 = vmul.f32 %v1682_v8, %v1092_v54  ;;  %v1249_v52 = vmul.f32 %v1686_v17, %v2682_v46  ;;  %v1688_v27 = vpop.eup %1687  ;;  %v1358_v6 = vadd.f32 %v2374_v23, %v1322_v28  ;;  %v1689_v23 = vld [vmem:[%s2753_s3] ss:$0 sm:$0xff]  ;;  %vm1255_vm4 = vweird.f32 %v1686_v17 }
 0x348   : > { %1391 = vst.msk [vmem:[%s2387_s17 + $0xe8] sm:$0xff] %vm578_vm2, %v1359_v60  ;;  %v1083_v14 = vmul.f32 %v1684_v58, %v1082_v5  ;;  %v1239_v42 = vmul.f32 %v1688_v27, %v2684_v56  ;;  %vm1245_vm6 = vweird.f32 %v1688_v27  ;;  %vm1256_vm7 = vmor %vm1254_vm5, %vm1255_vm4 }
 0x349   : > { %v1097_v1 = vsel %vm1096_vm0, %v1682_v8, %v1093_v19  ;;  %v1250_v39 = vmul.f32 %v1686_v17, %v1249_v52  ;;  %1390 = vst.msk [vmem:[%s2387_s17 + $0xe0] sm:$0xff] %vm578_vm2, %v1358_v6  ;;  %vm1246_vm9 = vmor %vm1244_vm8, %vm1245_vm6 }
 0x34a   : > { %v1273_v7 = vmul.f32 %v1097_v1, %v2329_v37  ;;  %v1087_v11 = vsel %vm1086_vm3, %v1684_v58, %v1083_v14  ;;  %v1240_v35 = vmul.f32 %v1688_v27, %v1239_v42  ;;  %v1690_v37 = vld [vmem:[%s2754_s4] ss:$0 sm:$0xff] }
 0x34b   : > { %v1251_v63 = vmul.f32 0.5, %v1250_v39  ;;  %v1272_v16 = vmul.f32 %v1087_v11, %v2322_v44 }
 0x34c   : > { %v1309_v45 = vmul.f32 %v1689_v23, %v1273_v7  ;;  %v1241_v4 = vmul.f32 0.5, %v1240_v35 }
 0x34d   : > { %v1252_v33 = vsub.f32 1.5, %v1251_v63  ;;  %v1308_v22 = vmul.f32 %v1689_v23, %v1272_v16 }
 0x34e   : > { %v1345_v59 = vadd.f32 %v1690_v37, %v1309_v45  ;;  %v1242_v30 = vsub.f32 1.5, %v1241_v4 }
 0x34f   : > { %v1253_v12 = vmul.f32 %v1686_v17, %v1252_v33  ;;  %v1344_v44 = vadd.f32 %v1690_v37, %v1308_v22 }
 0x350   : > { %1377 = vst.msk [vmem:[%s2387_s17 + $0x78] sm:$0xff] %vm578_vm2, %v1345_v59  ;;  %v1243_v24 = vmul.f32 %v1688_v27, %v1242_v30 }
 0x351   : > { %v1257_v2 = vsel %vm1256_vm7, %v1686_v17, %v1253_v12  ;;  %1376 = vst.msk [vmem:[%s2387_s17 + $0x70] sm:$0xff] %vm578_vm2, %v1344_v44 }
 0x352   : > { %v1289_v18 = vmul.f32 %v1257_v2, %v2343_v20  ;;  %v1247_v36 = vsel %vm1246_vm9, %v1688_v27, %v1243_v24 }
 0x353   : > { %v1288_v10 = vmul.f32 %v1247_v36, %v2336_v41 }
 0x354   : > { %v1325_v61 = vmul.f32 %v1689_v23, %v1289_v18 }
 0x355   : > { %v1324_v50 = vmul.f32 %v1689_v23, %v1288_v10 }
 0x356   : > { %v1361_v47 = vadd.f32 %v1690_v37, %v1325_v61 }
 0x357   : > { %v1360_v40 = vadd.f32 %v1690_v37, %v1324_v50 }
 0x358   : > { %1393 = vst.msk [vmem:[%s2387_s17 + $0xf8] sm:$0xff] %vm578_vm2, %v1361_v47 }
 0x359   : > { %1392 = vst.msk [vmem:[%s2387_s17 + $0xf0] sm:$0xff] %vm578_vm2, %v1360_v40 }
 0x35a PF: > { %s19_s23 = sadd.s32 1, %s1805_s23   ;;  %s2760_s18 = smov %s1789_s19 }
 0x35b   : > { %p16_p2 = scmp.ge.s32.totalorder %s19_s23, 4   ;;  %s2761_s19 = smov %s1793_s20 }
 0x35c   : > { %s2762_s20 = smov %s1909_s15  ;;  %s2763_s21 = smov %s1801_s22 }
 0x35d   : > { %s2764_s22 = smov %s2766_s8  ;;  %18 = sbr.rel (!%p16_p2) target bundleno = 5 (0x5), region = 84 }
 0x362   :  { %1424 = vsyncpa [#allocation3], 1 }
 0x363   :  { %1426 = vsyncpa [#allocation3 + $0x1], 1 }
 0x364   :  { %1427 = vsyncpa [#allocation5], 1 }

</bundles_post_ra>
